<compile_context>
chip_gen: v7x
topology: tpu7x:2x2x1
jax: 0.10.0
libtpu: 0.0.40
codegen_flags: <defaults>
</compile_context>

<pallas_src>
import functools

import jax
import jax.numpy as jnp
from jax.experimental import pallas as pl
from jax.experimental.pallas import tpu as pltpu

BN_EPS = 1e-5


def _round_up(x, m):
    return (x + m - 1) // m * m


# ------------------------------ Pallas kernel ------------------------------ #

def _make_basic_block_kernel(*, s, Bt, Ho, Wo, Hph, Wop2, Cin, Coutp, res_mode):
    """Fused BasicBlock kernel.

    res_mode: "shortcut" (identity or 1x1-conv projection, both via wsc matmul)
              or "none" (res=False path).
    Ref order: inputs..., output, p1 / y1-halo / p2 VMEM scratches.
    """
    Ms = Ho * Wo
    CENTER = 4          # tap (di=1, dj=1): its im2col columns == shortcut input

    def kernel(*refs):
        if res_mode == "shortcut":
            (xph_ref, w1_ref, w2_ref, wsc_ref,
             ab1_ref, ab2_ref, absc_ref, o_ref,
             p1_ref, y1_ref, p2_ref) = refs
        else:
            (xph_ref, w1_ref, w2_ref, ab1_ref, ab2_ref, o_ref,
             p1_ref, y1_ref, p2_ref) = refs

        # ---- conv1 im2col: (Bt*Ms, 9*Cin), tap-major / channel-minor ------- #
        for b in range(Bt):
            for di in range(3):
                for dj in range(3):
                    tap = di * 3 + dj
                    row0 = ((di % s) * s + (dj % s)) * Hph + di // s
                    col0 = dj // s
                    patch = xph_ref[b, row0:row0 + Ho, col0:col0 + Wo, :]
                    p1_ref[b * Ms:(b + 1) * Ms,
                           tap * Cin:(tap + 1) * Cin] = patch.reshape(Ms, Cin)

        # ---- conv1: ONE big-K MXU matmul, then BN*scale + ReLU in f32 ------ #
        acc1 = jnp.dot(p1_ref[...], w1_ref[...],
                       preferred_element_type=jnp.float32)
        y1 = jnp.maximum(acc1 * ab1_ref[0:1, :] + ab1_ref[1:2, :], 0.0)
        y1 = y1.astype(jnp.bfloat16)

        # ---- y1 -> VMEM halo scratch (zero only the 1-wide border) --------- #
        zrow = jnp.zeros((1, Wop2, Coutp), jnp.bfloat16)
        zcol = jnp.zeros((Ho, 1, Coutp), jnp.bfloat16)
        for b in range(Bt):
            y1_ref[b, 0:1, :, :] = zrow
            y1_ref[b, Ho + 1:Ho + 2, :, :] = zrow
            y1_ref[b, 1:Ho + 1, 0:1, :] = zcol
            y1_ref[b, 1:Ho + 1, Wo + 1:Wo + 2, :] = zcol
            y1_ref[b, 1:Ho + 1, 1:Wo + 1, :] = (
                y1[b * Ms:(b + 1) * Ms].reshape(Ho, Wo, Coutp))

        # ---- conv2 im2col: (Bt*Ms, 9*Coutp), 128-aligned tap columns ------- #
        for b in range(Bt):
            for di in range(3):
                for dj in range(3):
                    tap = di * 3 + dj
                    patch = y1_ref[b, di:di + Ho, dj:dj + Wo, :]
                    p2_ref[b * Ms:(b + 1) * Ms,
                           tap * Coutp:(tap + 1) * Coutp] = (
                        patch.reshape(Ms, Coutp))

        # ---- conv2: ONE big-K MXU matmul + BN affine ----------------------- #
        acc2 = jnp.dot(p2_ref[...], w2_ref[...],
                       preferred_element_type=jnp.float32)
        out = acc2 * ab2_ref[0:1, :] + ab2_ref[1:2, :]

        # ---- shortcut: reuse conv1 center-tap im2col columns (no extra HBM) - #
        if res_mode == "shortcut":
            xs = p1_ref[:, CENTER * Cin:(CENTER + 1) * Cin]
            resid = jnp.dot(xs, wsc_ref[...],
                            preferred_element_type=jnp.float32)
            out = out + (resid * absc_ref[0:1, :] + absc_ref[1:2, :])

        out = jnp.maximum(out, 0.0)
        o_ref[...] = out.reshape(Bt, Ho, Wo, Coutp).astype(o_ref.dtype)

    return kernel


# ------------------------------- JAX wrapper -------------------------------- #

def _bn_fold(gamma, beta, mean, var, eps=BN_EPS):
    a = gamma / jnp.sqrt(var + eps)
    b = beta - mean * a
    return a, b


def _phase_decompose(xpad, s):
    """(N, Hp, Wp, C) zero-padded NHWC -> (N, s*s*Hph, Wph, C) stride phases.

    Phase (r, c) holds rows r::s and cols c::s of the padded input, so a
    stride-s 3x3 tap (di, dj) becomes a *contiguous* (Ho, Wo) slice of phase
    (di % s, dj % s) at offset (di // s, dj // s)."""
    N, Hp, Wp, C = xpad.shape
    Hph = -(-Hp // s)
    Wph = -(-Wp // s)
    xpad = jnp.pad(xpad, ((0, 0), (0, Hph * s - Hp), (0, Wph * s - Wp), (0, 0)))
    xr = xpad.reshape(N, Hph, s, Wph, s, C)
    xr = jnp.transpose(xr, (0, 2, 4, 1, 3, 5))   # (N, r, c, Hph, Wph, C)
    return xr.reshape(N, s * s * Hph, Wph, C), Hph, Wph


def _auto_batch_tile(N, per_sample_bytes, budget=8 << 20):
    best = 1
    for d in range(1, N + 1):
        if N % d:
            continue
        if N >= 2 and N // d < 2:
            continue      # keep >= 2 grid steps so both v7x TensorCores get work
        if d * per_sample_bytes > budget:
            continue
        best = d
    return best


def _derive_vmem_limit(footprint_bytes):
    cap = 64 << 20                       # assume v7x 64 MiB/TC if query fails
    try:
        cap = int(pltpu.get_tpu_info().vmem_capacity_bytes)
    except Exception:
        pass
    limit = max(int(footprint_bytes) + (16 << 20), 32 << 20)
    return min(limit, (cap * 7) // 8)    # ~12.5% headroom for compiler scratch


def basic_block_forward(x_nchw, params, *, stride, scale, bn=True, res=True,
                        batch_tile=None):
    """Pallas implementation of BasicBlock.forward (inference-mode BN)."""
    s = int(stride)
    # NCHW -> NHWC and f32 -> bf16 once, at the block boundary.
    x = jnp.transpose(x_nchw, (0, 2, 3, 1)).astype(jnp.bfloat16)
    N, H, W, Cin = x.shape
    Cout = params["conv1_w"].shape[0]
    Coutp = _round_up(Cout, 128)          # lane-dense output channels / weights
    Ho = (H + 2 - 3) // s + 1
    Wo = (W + 2 - 3) // s + 1

    # Input: zero-pad (conv1 padding=1) + stride-phase re-layout (+8-sublane pad).
    xpad = jnp.pad(x, ((0, 0), (1, 1), (1, 1), (0, 0)))
    xph, Hph, Wph = _phase_decompose(xpad, s)
    Wphp = _round_up(Wph, 8)
    if Wphp != Wph:
        xph = jnp.pad(xph, ((0, 0), (0, 0), (0, Wphp - Wph), (0, 0)))

    # Weights: torch (Cout, Cin, 3, 3) -> one (9*Cin_p, Coutp) bf16 matrix
    # (tap-major, channel-minor rows -> matches the im2col column layout).
    def conv3x3_mat(w, cin, cin_p):
        co = w.shape[0]
        wt = jnp.transpose(w, (2, 3, 1, 0))                  # (3, 3, cin, co)
        wt = jnp.pad(wt, ((0, 0), (0, 0), (0, cin_p - cin), (0, Coutp - co)))
        return wt.reshape(9 * cin_p, Coutp).astype(jnp.bfloat16)

    w1 = conv3x3_mat(params["conv1_w"], Cin, Cin)            # K1 = 9*Cin
    w2 = conv3x3_mat(params["conv2_w"], Cout, Coutp)         # K2 = 9*Coutp

    # Inference BatchNorm (+ the nonlinearity scale) folded into (a, b).
    def ab_table(prefix, mul):
        if bn:
            a, b = _bn_fold(params[prefix + "_gamma"], params[prefix + "_beta"],
                            params[prefix + "_mean"], params[prefix + "_var"])
        else:
            a = jnp.ones((Cout,), jnp.float32)
            b = jnp.zeros((Cout,), jnp.float32)
        ab = jnp.stack([a * mul, b * mul], axis=0)           # (2, Cout)
        return jnp.pad(ab, ((0, 0), (0, Coutp - Cout))).astype(jnp.float32)

    ab1 = ab_table("bn1", scale)
    ab2 = ab_table("bn2", 1.0 if res else scale)

    # Shortcut: both identity and projection consume the conv1 center-tap
    # im2col columns inside the kernel; identity is a zero-padded eye matmul.
    if res:
        res_mode = "shortcut"
        if s != 1 or Cin != Cout:
            wsc = jnp.transpose(params["sc_w"][:, :, 0, 0], (1, 0))   # (Cin, Cout)
            wsc = jnp.pad(wsc, ((0, 0), (0, Coutp - Cout))).astype(jnp.bfloat16)
            absc = ab_table("bns", 1.0)
        else:
            wsc = jnp.pad(jnp.eye(Cin, dtype=jnp.bfloat16),
                          ((0, 0), (0, Coutp - Cin)))
            absc = jnp.stack([jnp.ones((Coutp,), jnp.float32),
                              jnp.zeros((Coutp,), jnp.float32)], axis=0)
    else:
        res_mode = "none"

    # Batch tiling: flatten Bt samples into the matmul M dimension per step.
    K1, K2 = 9 * Cin, 9 * Coutp
    Ms = Ho * Wo
    Wop2 = _round_up(Wo + 2, 8)
    bpe = 2                                                   # bf16
    per_sample_bytes = (Ms * (K1 + K2) * bpe                  # im2col scratches
                        + (Ho + 2) * Wop2 * Coutp * bpe       # y1 halo scratch
                        + 2 * (s * s * Hph * Wphp * Cin) * bpe  # in tile (2x buf)
                        + 2 * (Ms * Coutp) * bpe)             # out tile (2x buf)
    if batch_tile is None:
        batch_tile = _auto_batch_tile(N, per_sample_bytes)
    assert N % batch_tile == 0, (N, batch_tile)
    Bt = batch_tile
    M = Bt * Ms

    weight_bytes = (w1.size + w2.size) * bpe
    if res_mode == "shortcut":
        weight_bytes += wsc.size * bpe
    footprint = Bt * per_sample_bytes + 2 * weight_bytes + 6 * (2 * Coutp) * 4
    vmem_limit = _derive_vmem_limit(footprint)

    # BlockSpecs: activations tiled per batch-tile; weights / BN tables use
    # constant index maps so they stay VMEM-resident across grid steps.
    in_specs = [pl.BlockSpec((Bt, s * s * Hph, Wphp, Cin), lambda n: (n, 0, 0, 0)),
                pl.BlockSpec((K1, Coutp), lambda n: (0, 0)),
                pl.BlockSpec((K2, Coutp), lambda n: (0, 0))]
    args = [xph, w1, w2]
    if res_mode == "shortcut":
        in_specs.append(pl.BlockSpec((Cin, Coutp), lambda n: (0, 0)))
        args.append(wsc)
    in_specs += [pl.BlockSpec((2, Coutp), lambda n: (0, 0)),
                 pl.BlockSpec((2, Coutp), lambda n: (0, 0))]
    args += [ab1, ab2]
    if res_mode == "shortcut":
        in_specs.append(pl.BlockSpec((2, Coutp), lambda n: (0, 0)))
        args.append(absc)

    kernel = _make_basic_block_kernel(
        s=s, Bt=Bt, Ho=Ho, Wo=Wo, Hph=Hph, Wop2=Wop2,
        Cin=Cin, Coutp=Coutp, res_mode=res_mode)

    out = pl.pallas_call(
        kernel,
        out_shape=jax.ShapeDtypeStruct((N, Ho, Wo, Coutp), jnp.bfloat16),
        grid_spec=pltpu.PrefetchScalarGridSpec(
            num_scalar_prefetch=0,
            grid=(N // Bt,),
            in_specs=in_specs,
            out_specs=pl.BlockSpec((Bt, Ho, Wo, Coutp), lambda n: (n, 0, 0, 0)),
            scratch_shapes=[
                pltpu.VMEM((M, K1), jnp.bfloat16),                   # conv1 im2col
                pltpu.VMEM((Bt, Ho + 2, Wop2, Coutp), jnp.bfloat16),  # y1 halo
                pltpu.VMEM((M, K2), jnp.bfloat16),                   # conv2 im2col
            ]),
        compiler_params=pltpu.CompilerParams(
            dimension_semantics=("parallel",),
            vmem_limit_bytes=vmem_limit),
    )(*args)

    out = out[:, :, :, :Cout]                              # drop lane padding
    return jnp.transpose(out, (0, 3, 1, 2)).astype(jnp.float32)  # NHWC -> NCHW


# ---------------------------- pure-JAX reference ---------------------------- #

def ref_forward(x, params, *, stride, scale, bn=True, res=True):
    def conv(x, w, s, pad):
        return jax.lax.conv_general_dilated(
            x, w, (s, s), ((pad, pad), (pad, pad)),
            dimension_numbers=("NCHW", "OIHW", "NCHW"),
            precision=jax.lax.Precision.HIGHEST)

    def apply_bn(y, prefix):
        g = params[prefix + "_gamma"][None, :, None, None]
        b = params[prefix + "_beta"][None, :, None, None]
        m = params[prefix + "_mean"][None, :, None, None]
        v = params[prefix + "_var"][None, :, None, None]
        return (y - m) / jnp.sqrt(v + BN_EPS) * g + b

    o = conv(x, params["conv1_w"], stride, 1)
    if bn:
        o = apply_bn(o, "bn1")
    o = jax.nn.relu(o * scale)
    o2 = conv(o, params["conv2_w"], 1, 1)
    if bn:
        o2 = apply_bn(o2, "bn2")
    if res:
        if "sc_w" in params:
            r = conv(x, params["sc_w"], stride, 0)
            if bn:
                r = apply_bn(r, "bns")
        else:
            r = x
        return jax.nn.relu(o2 + r)
    return jax.nn.relu(o2 * scale)


# ---------------------------------- main ------------------------------------ #

def make_params(key, Cin, Cout, *, with_shortcut):
    ks = jax.random.split(key, 16)

    def bn_p(i, ch):
        return {
            "gamma": jax.random.uniform(ks[i], (ch,), minval=0.5, maxval=1.5),
            "beta": jax.random.normal(ks[i + 1], (ch,)) * 0.1,
            "mean": jax.random.normal(ks[i + 2], (ch,)) * 0.1,
            "var": jax.random.uniform(ks[i + 3], (ch,), minval=0.5, maxval=1.5),
        }

    p = {
        "conv1_w": jax.random.normal(ks[0], (Cout, Cin, 3, 3), jnp.float32) * 0.1,
        "conv2_w": jax.random.normal(ks[1], (Cout, Cout, 3, 3), jnp.float32) * 0.1,
    }
    for prefix, base in (("bn1", 4), ("bn2", 8)):
        for name, val in bn_p(base, Cout).items():
            p[f"{prefix}_{name}"] = val
    if with_shortcut:
        p["sc_w"] = jax.random.normal(ks[2], (Cout, Cin, 1, 1), jnp.float32) * 0.1
        for name, val in bn_p(12, Cout).items():
            p[f"bns_{name}"] = val
    return p


if __name__ == "__main__":
    key = jax.random.PRNGKey(0)
    kpa, kxa, kpb, kxb, kxd = jax.random.split(key, 5)

    # --- Config A: downsampling block (stride 2, 1x1 projection shortcut) --- #
    N, Cin, Cout, H, W, stride, scale = 2, 4, 8, 16, 16, 2, 0.5
    params_a = make_params(kpa, Cin, Cout, with_shortcut=True)
    x_a = jax.random.normal(kxa, (N, Cin, H, W), jnp.float32)

    fwd_a = jax.jit(functools.partial(
        basic_block_forward, stride=stride, scale=scale, bn=True, res=True))
    out_a = jax.block_until_ready(fwd_a(x_a, params_a))
    ref_a = ref_forward(x_a, params_a, stride=stride, scale=scale, bn=True, res=True)
    assert out_a.shape == (N, Cout, H // stride, W // stride), out_a.shape
    assert jnp.allclose(out_a, ref_a, atol=5e-2, rtol=5e-2), (
        float(jnp.max(jnp.abs(out_a - ref_a))))

    # --- Config B: identity-shortcut block (stride 1, Cin == Cout) ---------- #
    params_b = make_params(kpb, Cout, Cout, with_shortcut=False)
    x_b = jax.random.normal(kxb, (N, Cout, H, W), jnp.float32)
    fwd_b = jax.jit(functools.partial(
        basic_block_forward, stride=1, scale=scale, bn=True, res=True))
    out_b = jax.block_until_ready(fwd_b(x_b, params_b))
    ref_b = ref_forward(x_b, params_b, stride=1, scale=scale, bn=True, res=True)
    assert out_b.shape == (N, Cout, H, W), out_b.shape
    assert jnp.allclose(out_b, ref_b, atol=5e-2, rtol=5e-2), (
        float(jnp.max(jnp.abs(out_b - ref_b))))

    # --- Config C: res=False path (scale after both convs) ------------------ #
    fwd_c = jax.jit(functools.partial(
        basic_block_forward, stride=stride, scale=scale, bn=True, res=False))
    out_c = jax.block_until_ready(fwd_c(x_a, params_a))
    ref_c = ref_forward(x_a, params_a, stride=stride, scale=scale, bn=True, res=False)
    assert jnp.allclose(out_c, ref_c, atol=5e-2, rtol=5e-2), (
        float(jnp.max(jnp.abs(out_c - ref_c))))

    # --- Config D: batch tiling (N=4 -> batch_tile=2, 2 grid steps) --------- #
    x_d = jax.random.normal(kxd, (4, Cout, H, W), jnp.float32)
    fwd_d = jax.jit(functools.partial(
        basic_block_forward, stride=1, scale=scale, bn=True, res=True))
    out_d = jax.block_until_ready(fwd_d(x_d, params_b))
    ref_d = ref_forward(x_d, params_b, stride=1, scale=scale, bn=True, res=True)
    assert out_d.shape == (4, Cout, H, W), out_d.shape
    assert jnp.allclose(out_d, ref_d, atol=5e-2, rtol=5e-2), (
        float(jnp.max(jnp.abs(out_d - ref_d))))

    print("KERNEL_OK")
</pallas_src>

<mosaic_0001>
module attributes {stable_mosaic.version = 11 : i64} {
  func.func @kernel(%arg0: i32, %arg1: memref<1x36x16x4xbf16, #tpu.memory_space<vmem>>, %arg2: memref<36x128xbf16, #tpu.memory_space<vmem>>, %arg3: memref<1152x128xbf16, #tpu.memory_space<vmem>>, %arg4: memref<4x128xbf16, #tpu.memory_space<vmem>>, %arg5: memref<2x128xf32, #tpu.memory_space<vmem>>, %arg6: memref<2x128xf32, #tpu.memory_space<vmem>>, %arg7: memref<2x128xf32, #tpu.memory_space<vmem>>, %arg8: memref<1x8x8x128xbf16, #tpu.memory_space<vmem>>, %arg9: memref<64x36xbf16, #tpu.memory_space<vmem>>, %arg10: memref<1x10x16x128xbf16, #tpu.memory_space<vmem>>, %arg11: memref<64x1152xbf16, #tpu.memory_space<vmem>>) attributes {dimension_semantics = [#tpu.dimension_semantics<parallel>], iteration_bounds = array<i64: 2>, scalar_prefetch = 0 : i64, scratch_operands = 3 : i64, tpu.core_type = #tpu.core_type<tc>, window_params = [{transform_indices = @transform_0, window_bounds = array<i64: 1, 36, 16, 4>}, {pipeline_mode = #tpu.pipeline_mode<synchronous>, transform_indices = @transform_1, window_bounds = array<i64: 36, 128>}, {pipeline_mode = #tpu.pipeline_mode<synchronous>, transform_indices = @transform_2, window_bounds = array<i64: 1152, 128>}, {pipeline_mode = #tpu.pipeline_mode<synchronous>, transform_indices = @transform_3, window_bounds = array<i64: 4, 128>}, {pipeline_mode = #tpu.pipeline_mode<synchronous>, transform_indices = @transform_4, window_bounds = array<i64: 2, 128>}, {pipeline_mode = #tpu.pipeline_mode<synchronous>, transform_indices = @transform_5, window_bounds = array<i64: 2, 128>}, {pipeline_mode = #tpu.pipeline_mode<synchronous>, transform_indices = @transform_6, window_bounds = array<i64: 2, 128>}, {transform_indices = @transform_7, window_bounds = array<i64: 1, 8, 8, 128>}]} {
    %c0 = arith.constant 0 : index
    %c0_0 = arith.constant 0 : index
    %c0_1 = arith.constant 0 : index
    %c0_2 = arith.constant 0 : index
    %0 = vector.load %arg1[%c0, %c0_0, %c0_1, %c0_2] : memref<1x36x16x4xbf16, #tpu.memory_space<vmem>>, vector<1x8x8x4xbf16>
    %1 = vector.shape_cast %0 : vector<1x8x8x4xbf16> to vector<8x8x4xbf16>
    %2 = vector.shape_cast %1 : vector<8x8x4xbf16> to vector<64x4xbf16>
    %c0_3 = arith.constant 0 : index
    %c0_4 = arith.constant 0 : index
    %3 = vector.load %arg9[%c0_3, %c0_4] : memref<64x36xbf16, #tpu.memory_space<vmem>>, vector<64x4xbf16>
    tpu.vector_store %arg9[%c0_3, %c0_4], %2 {strides = array<i32>} : memref<64x36xbf16, #tpu.memory_space<vmem>>, vector<64x4xbf16>,
    %c0_5 = arith.constant 0 : index
    %c9 = arith.constant 9 : index
    %c0_6 = arith.constant 0 : index
    %c0_7 = arith.constant 0 : index
    %4 = vector.load %arg1[%c0_5, %c9, %c0_6, %c0_7] : memref<1x36x16x4xbf16, #tpu.memory_space<vmem>>, vector<1x8x8x4xbf16>
    %5 = vector.shape_cast %4 : vector<1x8x8x4xbf16> to vector<8x8x4xbf16>
    %6 = vector.shape_cast %5 : vector<8x8x4xbf16> to vector<64x4xbf16>
    %c0_8 = arith.constant 0 : index
    %c4 = arith.constant 4 : index
    %7 = vector.load %arg9[%c0_8, %c4] : memref<64x36xbf16, #tpu.memory_space<vmem>>, vector<64x4xbf16>
    tpu.vector_store %arg9[%c0_8, %c4], %6 {strides = array<i32>} : memref<64x36xbf16, #tpu.memory_space<vmem>>, vector<64x4xbf16>,
    %c0_9 = arith.constant 0 : index
    %c0_10 = arith.constant 0 : index
    %c1 = arith.constant 1 : index
    %c0_11 = arith.constant 0 : index
    %8 = vector.load %arg1[%c0_9, %c0_10, %c1, %c0_11] : memref<1x36x16x4xbf16, #tpu.memory_space<vmem>>, vector<1x8x8x4xbf16>
    %9 = vector.shape_cast %8 : vector<1x8x8x4xbf16> to vector<8x8x4xbf16>
    %10 = vector.shape_cast %9 : vector<8x8x4xbf16> to vector<64x4xbf16>
    %c0_12 = arith.constant 0 : index
    %c8 = arith.constant 8 : index
    %11 = vector.load %arg9[%c0_12, %c8] : memref<64x36xbf16, #tpu.memory_space<vmem>>, vector<64x4xbf16>
    tpu.vector_store %arg9[%c0_12, %c8], %10 {strides = array<i32>} : memref<64x36xbf16, #tpu.memory_space<vmem>>, vector<64x4xbf16>,
    %c0_13 = arith.constant 0 : index
    %c18 = arith.constant 18 : index
    %c0_14 = arith.constant 0 : index
    %c0_15 = arith.constant 0 : index
    %12 = vector.load %arg1[%c0_13, %c18, %c0_14, %c0_15] : memref<1x36x16x4xbf16, #tpu.memory_space<vmem>>, vector<1x8x8x4xbf16>
    %13 = vector.shape_cast %12 : vector<1x8x8x4xbf16> to vector<8x8x4xbf16>
    %14 = vector.shape_cast %13 : vector<8x8x4xbf16> to vector<64x4xbf16>
    %c0_16 = arith.constant 0 : index
    %c12 = arith.constant 12 : index
    %15 = vector.load %arg9[%c0_16, %c12] : memref<64x36xbf16, #tpu.memory_space<vmem>>, vector<64x4xbf16>
    tpu.vector_store %arg9[%c0_16, %c12], %14 {strides = array<i32>} : memref<64x36xbf16, #tpu.memory_space<vmem>>, vector<64x4xbf16>,
    %c0_17 = arith.constant 0 : index
    %c27 = arith.constant 27 : index
    %c0_18 = arith.constant 0 : index
    %c0_19 = arith.constant 0 : index
    %16 = vector.load %arg1[%c0_17, %c27, %c0_18, %c0_19] : memref<1x36x16x4xbf16, #tpu.memory_space<vmem>>, vector<1x8x8x4xbf16>
    %17 = vector.shape_cast %16 : vector<1x8x8x4xbf16> to vector<8x8x4xbf16>
    %18 = vector.shape_cast %17 : vector<8x8x4xbf16> to vector<64x4xbf16>
    %c0_20 = arith.constant 0 : index
    %c16 = arith.constant 16 : index
    %19 = vector.load %arg9[%c0_20, %c16] : memref<64x36xbf16, #tpu.memory_space<vmem>>, vector<64x4xbf16>
    tpu.vector_store %arg9[%c0_20, %c16], %18 {strides = array<i32>} : memref<64x36xbf16, #tpu.memory_space<vmem>>, vector<64x4xbf16>,
    %c0_21 = arith.constant 0 : index
    %c18_22 = arith.constant 18 : index
    %c1_23 = arith.constant 1 : index
    %c0_24 = arith.constant 0 : index
    %20 = vector.load %arg1[%c0_21, %c18_22, %c1_23, %c0_24] : memref<1x36x16x4xbf16, #tpu.memory_space<vmem>>, vector<1x8x8x4xbf16>
    %21 = vector.shape_cast %20 : vector<1x8x8x4xbf16> to vector<8x8x4xbf16>
    %22 = vector.shape_cast %21 : vector<8x8x4xbf16> to vector<64x4xbf16>
    %c0_25 = arith.constant 0 : index
    %c20 = arith.constant 20 : index
    %23 = vector.load %arg9[%c0_25, %c20] : memref<64x36xbf16, #tpu.memory_space<vmem>>, vector<64x4xbf16>
    tpu.vector_store %arg9[%c0_25, %c20], %22 {strides = array<i32>} : memref<64x36xbf16, #tpu.memory_space<vmem>>, vector<64x4xbf16>,
    %c0_26 = arith.constant 0 : index
    %c1_27 = arith.constant 1 : index
    %c0_28 = arith.constant 0 : index
    %c0_29 = arith.constant 0 : index
    %24 = vector.load %arg1[%c0_26, %c1_27, %c0_28, %c0_29] : memref<1x36x16x4xbf16, #tpu.memory_space<vmem>>, vector<1x8x8x4xbf16>
    %25 = vector.shape_cast %24 : vector<1x8x8x4xbf16> to vector<8x8x4xbf16>
    %26 = vector.shape_cast %25 : vector<8x8x4xbf16> to vector<64x4xbf16>
    %c0_30 = arith.constant 0 : index
    %c24 = arith.constant 24 : index
    %27 = vector.load %arg9[%c0_30, %c24] : memref<64x36xbf16, #tpu.memory_space<vmem>>, vector<64x4xbf16>
    tpu.vector_store %arg9[%c0_30, %c24], %26 {strides = array<i32>} : memref<64x36xbf16, #tpu.memory_space<vmem>>, vector<64x4xbf16>,
    %c0_31 = arith.constant 0 : index
    %c10 = arith.constant 10 : index
    %c0_32 = arith.constant 0 : index
    %c0_33 = arith.constant 0 : index
    %28 = vector.load %arg1[%c0_31, %c10, %c0_32, %c0_33] : memref<1x36x16x4xbf16, #tpu.memory_space<vmem>>, vector<1x8x8x4xbf16>
    %29 = vector.shape_cast %28 : vector<1x8x8x4xbf16> to vector<8x8x4xbf16>
    %30 = vector.shape_cast %29 : vector<8x8x4xbf16> to vector<64x4xbf16>
    %c0_34 = arith.constant 0 : index
    %c28 = arith.constant 28 : index
    %31 = vector.load %arg9[%c0_34, %c28] : memref<64x36xbf16, #tpu.memory_space<vmem>>, vector<64x4xbf16>
    tpu.vector_store %arg9[%c0_34, %c28], %30 {strides = array<i32>} : memref<64x36xbf16, #tpu.memory_space<vmem>>, vector<64x4xbf16>,
    %c0_35 = arith.constant 0 : index
    %c1_36 = arith.constant 1 : index
    %c1_37 = arith.constant 1 : index
    %c0_38 = arith.constant 0 : index
    %32 = vector.load %arg1[%c0_35, %c1_36, %c1_37, %c0_38] : memref<1x36x16x4xbf16, #tpu.memory_space<vmem>>, vector<1x8x8x4xbf16>
    %33 = vector.shape_cast %32 : vector<1x8x8x4xbf16> to vector<8x8x4xbf16>
    %34 = vector.shape_cast %33 : vector<8x8x4xbf16> to vector<64x4xbf16>
    %c0_39 = arith.constant 0 : index
    %c32 = arith.constant 32 : index
    %35 = vector.load %arg9[%c0_39, %c32] : memref<64x36xbf16, #tpu.memory_space<vmem>>, vector<64x4xbf16>
    tpu.vector_store %arg9[%c0_39, %c32], %34 {strides = array<i32>} : memref<64x36xbf16, #tpu.memory_space<vmem>>, vector<64x4xbf16>,
    %c0_40 = arith.constant 0 : index
    %c0_41 = arith.constant 0 : index
    %36 = vector.load %arg9[%c0_40, %c0_41] : memref<64x36xbf16, #tpu.memory_space<vmem>>, vector<64x36xbf16>
    %c0_42 = arith.constant 0 : index
    %c0_43 = arith.constant 0 : index
    %37 = vector.load %arg2[%c0_42, %c0_43] : memref<36x128xbf16, #tpu.memory_space<vmem>>, vector<36x128xbf16>
    %cst = arith.constant dense<0.000000e+00> : vector<64x128xf32>
    %38 = tpu.matmul %36, %37, %cst {dimension_numbers = #tpu.dot_dimension_numbers<[1], [0], [0], [1], [0, 0, 1, 1], [], []>} : vector<64x36xbf16>, vector<36x128xbf16>, vector<64x128xf32> -> vector<64x128xf32>
    %c0_44 = arith.constant 0 : index
    %c0_45 = arith.constant 0 : index
    %39 = vector.load %arg5[%c0_44, %c0_45] : memref<2x128xf32, #tpu.memory_space<vmem>>, vector<1x128xf32>
    %40 = vector.broadcast %39 : vector<1x128xf32> to vector<64x128xf32>
    %41 = arith.mulf %38, %40 : vector<64x128xf32>
    %c1_46 = arith.constant 1 : index
    %c0_47 = arith.constant 0 : index
    %42 = vector.load %arg5[%c1_46, %c0_47] : memref<2x128xf32, #tpu.memory_space<vmem>>, vector<1x128xf32>
    %43 = vector.broadcast %42 : vector<1x128xf32> to vector<64x128xf32>
    %44 = arith.addf %41, %43 : vector<64x128xf32>
    %cst_48 = arith.constant 0.000000e+00 : f32
    %45 = vector.broadcast %cst_48 : f32 to vector<64x128xf32>
    %46 = arith.maximumf %44, %45 : vector<64x128xf32>
    %47 = arith.truncf %46 : vector<64x128xf32> to vector<64x128xbf16>
    %cst_49 = arith.constant 0.000000e+00 : bf16
    %48 = vector.broadcast %cst_49 : bf16 to vector<1x16x128xbf16>
    %cst_50 = arith.constant 0.000000e+00 : bf16
    %49 = vector.broadcast %cst_50 : bf16 to vector<8x1x128xbf16>
    %c0_51 = arith.constant 0 : index
    %c0_52 = arith.constant 0 : index
    %c0_53 = arith.constant 0 : index
    %c0_54 = arith.constant 0 : index
    %50 = vector.load %arg10[%c0_51, %c0_52, %c0_53, %c0_54] : memref<1x10x16x128xbf16, #tpu.memory_space<vmem>>, vector<1x1x16x128xbf16>
    %51 = vector.shape_cast %50 : vector<1x1x16x128xbf16> to vector<1x16x128xbf16>
    %52 = vector.shape_cast %48 : vector<1x16x128xbf16> to vector<1x1x16x128xbf16>
    tpu.vector_store %arg10[%c0_51, %c0_52, %c0_53, %c0_54], %52 {strides = array<i32>} : memref<1x10x16x128xbf16, #tpu.memory_space<vmem>>, vector<1x1x16x128xbf16>,
    %c0_55 = arith.constant 0 : index
    %c9_56 = arith.constant 9 : index
    %c0_57 = arith.constant 0 : index
    %c0_58 = arith.constant 0 : index
    %53 = vector.load %arg10[%c0_55, %c9_56, %c0_57, %c0_58] : memref<1x10x16x128xbf16, #tpu.memory_space<vmem>>, vector<1x1x16x128xbf16>
    %54 = vector.shape_cast %53 : vector<1x1x16x128xbf16> to vector<1x16x128xbf16>
    %55 = vector.shape_cast %48 : vector<1x16x128xbf16> to vector<1x1x16x128xbf16>
    tpu.vector_store %arg10[%c0_55, %c9_56, %c0_57, %c0_58], %55 {strides = array<i32>} : memref<1x10x16x128xbf16, #tpu.memory_space<vmem>>, vector<1x1x16x128xbf16>,
    %c0_59 = arith.constant 0 : index
    %c1_60 = arith.constant 1 : index
    %c0_61 = arith.constant 0 : index
    %c0_62 = arith.constant 0 : index
    %56 = vector.load %arg10[%c0_59, %c1_60, %c0_61, %c0_62] : memref<1x10x16x128xbf16, #tpu.memory_space<vmem>>, vector<1x8x1x128xbf16>
    %57 = vector.shape_cast %56 : vector<1x8x1x128xbf16> to vector<8x1x128xbf16>
    %58 = vector.shape_cast %49 : vector<8x1x128xbf16> to vector<1x8x1x128xbf16>
    tpu.vector_store %arg10[%c0_59, %c1_60, %c0_61, %c0_62], %58 {strides = array<i32>} : memref<1x10x16x128xbf16, #tpu.memory_space<vmem>>, vector<1x8x1x128xbf16>,
    %c0_63 = arith.constant 0 : index
    %c1_64 = arith.constant 1 : index
    %c9_65 = arith.constant 9 : index
    %c0_66 = arith.constant 0 : index
    %59 = vector.load %arg10[%c0_63, %c1_64, %c9_65, %c0_66] : memref<1x10x16x128xbf16, #tpu.memory_space<vmem>>, vector<1x8x1x128xbf16>
    %60 = vector.shape_cast %59 : vector<1x8x1x128xbf16> to vector<8x1x128xbf16>
    %61 = vector.shape_cast %49 : vector<8x1x128xbf16> to vector<1x8x1x128xbf16>
    tpu.vector_store %arg10[%c0_63, %c1_64, %c9_65, %c0_66], %61 {strides = array<i32>} : memref<1x10x16x128xbf16, #tpu.memory_space<vmem>>, vector<1x8x1x128xbf16>,
    %62 = vector.shape_cast %47 : vector<64x128xbf16> to vector<8x8x128xbf16>
    %c0_67 = arith.constant 0 : index
    %c1_68 = arith.constant 1 : index
    %c1_69 = arith.constant 1 : index
    %c0_70 = arith.constant 0 : index
    %63 = vector.load %arg10[%c0_67, %c1_68, %c1_69, %c0_70] : memref<1x10x16x128xbf16, #tpu.memory_space<vmem>>, vector<1x8x8x128xbf16>
    %64 = vector.shape_cast %63 : vector<1x8x8x128xbf16> to vector<8x8x128xbf16>
    %65 = vector.shape_cast %62 : vector<8x8x128xbf16> to vector<1x8x8x128xbf16>
    tpu.vector_store %arg10[%c0_67, %c1_68, %c1_69, %c0_70], %65 {strides = array<i32>} : memref<1x10x16x128xbf16, #tpu.memory_space<vmem>>, vector<1x8x8x128xbf16>,
    %c0_71 = arith.constant 0 : index
    %c0_72 = arith.constant 0 : index
    %c0_73 = arith.constant 0 : index
    %c0_74 = arith.constant 0 : index
    %66 = vector.load %arg10[%c0_71, %c0_72, %c0_73, %c0_74] : memref<1x10x16x128xbf16, #tpu.memory_space<vmem>>, vector<1x8x8x128xbf16>
    %67 = vector.shape_cast %66 : vector<1x8x8x128xbf16> to vector<8x8x128xbf16>
    %68 = vector.shape_cast %67 : vector<8x8x128xbf16> to vector<64x128xbf16>
    %c0_75 = arith.constant 0 : index
    %c0_76 = arith.constant 0 : index
    %69 = vector.load %arg11[%c0_75, %c0_76] : memref<64x1152xbf16, #tpu.memory_space<vmem>>, vector<64x128xbf16>
    tpu.vector_store %arg11[%c0_75, %c0_76], %68 {strides = array<i32>} : memref<64x1152xbf16, #tpu.memory_space<vmem>>, vector<64x128xbf16>,
    %c0_77 = arith.constant 0 : index
    %c0_78 = arith.constant 0 : index
    %c1_79 = arith.constant 1 : index
    %c0_80 = arith.constant 0 : index
    %70 = vector.load %arg10[%c0_77, %c0_78, %c1_79, %c0_80] : memref<1x10x16x128xbf16, #tpu.memory_space<vmem>>, vector<1x8x8x128xbf16>
    %71 = vector.shape_cast %70 : vector<1x8x8x128xbf16> to vector<8x8x128xbf16>
    %72 = vector.shape_cast %71 : vector<8x8x128xbf16> to vector<64x128xbf16>
    %c0_81 = arith.constant 0 : index
    %c128 = arith.constant 128 : index
    %73 = vector.load %arg11[%c0_81, %c128] : memref<64x1152xbf16, #tpu.memory_space<vmem>>, vector<64x128xbf16>
    tpu.vector_store %arg11[%c0_81, %c128], %72 {strides = array<i32>} : memref<64x1152xbf16, #tpu.memory_space<vmem>>, vector<64x128xbf16>,
    %c0_82 = arith.constant 0 : index
    %c0_83 = arith.constant 0 : index
    %c2 = arith.constant 2 : index
    %c0_84 = arith.constant 0 : index
    %74 = vector.load %arg10[%c0_82, %c0_83, %c2, %c0_84] : memref<1x10x16x128xbf16, #tpu.memory_space<vmem>>, vector<1x8x8x128xbf16>
    %75 = vector.shape_cast %74 : vector<1x8x8x128xbf16> to vector<8x8x128xbf16>
    %76 = vector.shape_cast %75 : vector<8x8x128xbf16> to vector<64x128xbf16>
    %c0_85 = arith.constant 0 : index
    %c256 = arith.constant 256 : index
    %77 = vector.load %arg11[%c0_85, %c256] : memref<64x1152xbf16, #tpu.memory_space<vmem>>, vector<64x128xbf16>
    tpu.vector_store %arg11[%c0_85, %c256], %76 {strides = array<i32>} : memref<64x1152xbf16, #tpu.memory_space<vmem>>, vector<64x128xbf16>,
    %c0_86 = arith.constant 0 : index
    %c1_87 = arith.constant 1 : index
    %c0_88 = arith.constant 0 : index
    %c0_89 = arith.constant 0 : index
    %78 = vector.load %arg10[%c0_86, %c1_87, %c0_88, %c0_89] : memref<1x10x16x128xbf16, #tpu.memory_space<vmem>>, vector<1x8x8x128xbf16>
    %79 = vector.shape_cast %78 : vector<1x8x8x128xbf16> to vector<8x8x128xbf16>
    %80 = vector.shape_cast %79 : vector<8x8x128xbf16> to vector<64x128xbf16>
    %c0_90 = arith.constant 0 : index
    %c384 = arith.constant 384 : index
    %81 = vector.load %arg11[%c0_90, %c384] : memref<64x1152xbf16, #tpu.memory_space<vmem>>, vector<64x128xbf16>
    tpu.vector_store %arg11[%c0_90, %c384], %80 {strides = array<i32>} : memref<64x1152xbf16, #tpu.memory_space<vmem>>, vector<64x128xbf16>,
    %c0_91 = arith.constant 0 : index
    %c1_92 = arith.constant 1 : index
    %c1_93 = arith.constant 1 : index
    %c0_94 = arith.constant 0 : index
    %82 = vector.load %arg10[%c0_91, %c1_92, %c1_93, %c0_94] : memref<1x10x16x128xbf16, #tpu.memory_space<vmem>>, vector<1x8x8x128xbf16>
    %83 = vector.shape_cast %82 : vector<1x8x8x128xbf16> to vector<8x8x128xbf16>
    %84 = vector.shape_cast %83 : vector<8x8x128xbf16> to vector<64x128xbf16>
    %c0_95 = arith.constant 0 : index
    %c512 = arith.constant 512 : index
    %85 = vector.load %arg11[%c0_95, %c512] : memref<64x1152xbf16, #tpu.memory_space<vmem>>, vector<64x128xbf16>
    tpu.vector_store %arg11[%c0_95, %c512], %84 {strides = array<i32>} : memref<64x1152xbf16, #tpu.memory_space<vmem>>, vector<64x128xbf16>,
    %c0_96 = arith.constant 0 : index
    %c1_97 = arith.constant 1 : index
    %c2_98 = arith.constant 2 : index
    %c0_99 = arith.constant 0 : index
    %86 = vector.load %arg10[%c0_96, %c1_97, %c2_98, %c0_99] : memref<1x10x16x128xbf16, #tpu.memory_space<vmem>>, vector<1x8x8x128xbf16>
    %87 = vector.shape_cast %86 : vector<1x8x8x128xbf16> to vector<8x8x128xbf16>
    %88 = vector.shape_cast %87 : vector<8x8x128xbf16> to vector<64x128xbf16>
    %c0_100 = arith.constant 0 : index
    %c640 = arith.constant 640 : index
    %89 = vector.load %arg11[%c0_100, %c640] : memref<64x1152xbf16, #tpu.memory_space<vmem>>, vector<64x128xbf16>
    tpu.vector_store %arg11[%c0_100, %c640], %88 {strides = array<i32>} : memref<64x1152xbf16, #tpu.memory_space<vmem>>, vector<64x128xbf16>,
    %c0_101 = arith.constant 0 : index
    %c2_102 = arith.constant 2 : index
    %c0_103 = arith.constant 0 : index
    %c0_104 = arith.constant 0 : index
    %90 = vector.load %arg10[%c0_101, %c2_102, %c0_103, %c0_104] : memref<1x10x16x128xbf16, #tpu.memory_space<vmem>>, vector<1x8x8x128xbf16>
    %91 = vector.shape_cast %90 : vector<1x8x8x128xbf16> to vector<8x8x128xbf16>
    %92 = vector.shape_cast %91 : vector<8x8x128xbf16> to vector<64x128xbf16>
    %c0_105 = arith.constant 0 : index
    %c768 = arith.constant 768 : index
    %93 = vector.load %arg11[%c0_105, %c768] : memref<64x1152xbf16, #tpu.memory_space<vmem>>, vector<64x128xbf16>
    tpu.vector_store %arg11[%c0_105, %c768], %92 {strides = array<i32>} : memref<64x1152xbf16, #tpu.memory_space<vmem>>, vector<64x128xbf16>,
    %c0_106 = arith.constant 0 : index
    %c2_107 = arith.constant 2 : index
    %c1_108 = arith.constant 1 : index
    %c0_109 = arith.constant 0 : index
    %94 = vector.load %arg10[%c0_106, %c2_107, %c1_108, %c0_109] : memref<1x10x16x128xbf16, #tpu.memory_space<vmem>>, vector<1x8x8x128xbf16>
    %95 = vector.shape_cast %94 : vector<1x8x8x128xbf16> to vector<8x8x128xbf16>
    %96 = vector.shape_cast %95 : vector<8x8x128xbf16> to vector<64x128xbf16>
    %c0_110 = arith.constant 0 : index
    %c896 = arith.constant 896 : index
    %97 = vector.load %arg11[%c0_110, %c896] : memref<64x1152xbf16, #tpu.memory_space<vmem>>, vector<64x128xbf16>
    tpu.vector_store %arg11[%c0_110, %c896], %96 {strides = array<i32>} : memref<64x1152xbf16, #tpu.memory_space<vmem>>, vector<64x128xbf16>,
    %c0_111 = arith.constant 0 : index
    %c2_112 = arith.constant 2 : index
    %c2_113 = arith.constant 2 : index
    %c0_114 = arith.constant 0 : index
    %98 = vector.load %arg10[%c0_111, %c2_112, %c2_113, %c0_114] : memref<1x10x16x128xbf16, #tpu.memory_space<vmem>>, vector<1x8x8x128xbf16>
    %99 = vector.shape_cast %98 : vector<1x8x8x128xbf16> to vector<8x8x128xbf16>
    %100 = vector.shape_cast %99 : vector<8x8x128xbf16> to vector<64x128xbf16>
    %c0_115 = arith.constant 0 : index
    %c1024 = arith.constant 1024 : index
    %101 = vector.load %arg11[%c0_115, %c1024] : memref<64x1152xbf16, #tpu.memory_space<vmem>>, vector<64x128xbf16>
    tpu.vector_store %arg11[%c0_115, %c1024], %100 {strides = array<i32>} : memref<64x1152xbf16, #tpu.memory_space<vmem>>, vector<64x128xbf16>,
    %c0_116 = arith.constant 0 : index
    %c0_117 = arith.constant 0 : index
    %102 = vector.load %arg11[%c0_116, %c0_117] : memref<64x1152xbf16, #tpu.memory_space<vmem>>, vector<64x1152xbf16>
    %c0_118 = arith.constant 0 : index
    %c0_119 = arith.constant 0 : index
    %103 = vector.load %arg3[%c0_118, %c0_119] : memref<1152x128xbf16, #tpu.memory_space<vmem>>, vector<1152x128xbf16>
    %cst_120 = arith.constant dense<0.000000e+00> : vector<64x128xf32>
    %104 = tpu.matmul %102, %103, %cst_120 {dimension_numbers = #tpu.dot_dimension_numbers<[1], [0], [0], [1], [0, 0, 1, 1], [], []>} : vector<64x1152xbf16>, vector<1152x128xbf16>, vector<64x128xf32> -> vector<64x128xf32>
    %c0_121 = arith.constant 0 : index
    %c0_122 = arith.constant 0 : index
    %105 = vector.load %arg6[%c0_121, %c0_122] : memref<2x128xf32, #tpu.memory_space<vmem>>, vector<1x128xf32>
    %106 = vector.broadcast %105 : vector<1x128xf32> to vector<64x128xf32>
    %107 = arith.mulf %104, %106 : vector<64x128xf32>
    %c1_123 = arith.constant 1 : index
    %c0_124 = arith.constant 0 : index
    %108 = vector.load %arg6[%c1_123, %c0_124] : memref<2x128xf32, #tpu.memory_space<vmem>>, vector<1x128xf32>
    %109 = vector.broadcast %108 : vector<1x128xf32> to vector<64x128xf32>
    %110 = arith.addf %107, %109 : vector<64x128xf32>
    %c0_125 = arith.constant 0 : index
    %c16_126 = arith.constant 16 : index
    %111 = vector.load %arg9[%c0_125, %c16_126] : memref<64x36xbf16, #tpu.memory_space<vmem>>, vector<64x4xbf16>
    %c0_127 = arith.constant 0 : index
    %c0_128 = arith.constant 0 : index
    %112 = vector.load %arg4[%c0_127, %c0_128] : memref<4x128xbf16, #tpu.memory_space<vmem>>, vector<4x128xbf16>
    %cst_129 = arith.constant dense<0.000000e+00> : vector<64x128xf32>
    %113 = tpu.matmul %111, %112, %cst_129 {dimension_numbers = #tpu.dot_dimension_numbers<[1], [0], [0], [1], [0, 0, 1, 1], [], []>} : vector<64x4xbf16>, vector<4x128xbf16>, vector<64x128xf32> -> vector<64x128xf32>
    %c0_130 = arith.constant 0 : index
    %c0_131 = arith.constant 0 : index
    %114 = vector.load %arg7[%c0_130, %c0_131] : memref<2x128xf32, #tpu.memory_space<vmem>>, vector<1x128xf32>
    %115 = vector.broadcast %114 : vector<1x128xf32> to vector<64x128xf32>
    %116 = arith.mulf %113, %115 : vector<64x128xf32>
    %c1_132 = arith.constant 1 : index
    %c0_133 = arith.constant 0 : index
    %117 = vector.load %arg7[%c1_132, %c0_133] : memref<2x128xf32, #tpu.memory_space<vmem>>, vector<1x128xf32>
    %118 = vector.broadcast %117 : vector<1x128xf32> to vector<64x128xf32>
    %119 = arith.addf %116, %118 : vector<64x128xf32>
    %120 = arith.addf %110, %119 : vector<64x128xf32>
    %cst_134 = arith.constant 0.000000e+00 : f32
    %121 = vector.broadcast %cst_134 : f32 to vector<64x128xf32>
    %122 = arith.maximumf %120, %121 : vector<64x128xf32>
    %123 = vector.shape_cast %122 : vector<64x128xf32> to vector<1x8x8x128xf32>
    %124 = arith.truncf %123 : vector<1x8x8x128xf32> to vector<1x8x8x128xbf16>
    %c0_135 = arith.constant 0 : index
    %c0_136 = arith.constant 0 : index
    %c0_137 = arith.constant 0 : index
    %c0_138 = arith.constant 0 : index
    %125 = vector.load %arg8[%c0_135, %c0_136, %c0_137, %c0_138] : memref<1x8x8x128xbf16, #tpu.memory_space<vmem>>, vector<1x8x8x128xbf16>
    tpu.vector_store %arg8[%c0_135, %c0_136, %c0_137, %c0_138], %124 {strides = array<i32>} : memref<1x8x8x128xbf16, #tpu.memory_space<vmem>>, vector<1x8x8x128xbf16>,
    return
  }
  func.func @transform_0(%arg0: i32) -> (i32, i32, i32, i32) {
    %c0_i32 = arith.constant 0 : i32
    %c0_i32_0 = arith.constant 0 : i32
    %c0_i32_1 = arith.constant 0 : i32
    %c0_i32_2 = arith.constant 0 : i32
    return %arg0, %c0_i32, %c0_i32_0, %c0_i32_1 : i32, i32, i32, i32
  }
  func.func @transform_1(%arg0: i32) -> (i32, i32) {
    %c0_i32 = arith.constant 0 : i32
    %c0_i32_0 = arith.constant 0 : i32
    %c0_i32_1 = arith.constant 0 : i32
    return %c0_i32, %c0_i32_0 : i32, i32
  }
  func.func @transform_2(%arg0: i32) -> (i32, i32) {
    %c0_i32 = arith.constant 0 : i32
    %c0_i32_0 = arith.constant 0 : i32
    %c0_i32_1 = arith.constant 0 : i32
    return %c0_i32, %c0_i32_0 : i32, i32
  }
  func.func @transform_3(%arg0: i32) -> (i32, i32) {
    %c0_i32 = arith.constant 0 : i32
    %c0_i32_0 = arith.constant 0 : i32
    %c0_i32_1 = arith.constant 0 : i32
    return %c0_i32, %c0_i32_0 : i32, i32
  }
  func.func @transform_4(%arg0: i32) -> (i32, i32) {
    %c0_i32 = arith.constant 0 : i32
    %c0_i32_0 = arith.constant 0 : i32
    %c0_i32_1 = arith.constant 0 : i32
    return %c0_i32, %c0_i32_0 : i32, i32
  }
  func.func @transform_5(%arg0: i32) -> (i32, i32) {
    %c0_i32 = arith.constant 0 : i32
    %c0_i32_0 = arith.constant 0 : i32
    %c0_i32_1 = arith.constant 0 : i32
    return %c0_i32, %c0_i32_0 : i32, i32
  }
  func.func @transform_6(%arg0: i32) -> (i32, i32) {
    %c0_i32 = arith.constant 0 : i32
    %c0_i32_0 = arith.constant 0 : i32
    %c0_i32_1 = arith.constant 0 : i32
    return %c0_i32, %c0_i32_0 : i32, i32
  }
  func.func @transform_7(%arg0: i32) -> (i32, i32, i32, i32) {
    %c0_i32 = arith.constant 0 : i32
    %c0_i32_0 = arith.constant 0 : i32
    %c0_i32_1 = arith.constant 0 : i32
    %c0_i32_2 = arith.constant 0 : i32
    return %arg0, %c0_i32, %c0_i32_0, %c0_i32_1 : i32, i32, i32, i32
  }
}

</mosaic_0001>

<bundles_post_ra>
// kernel: basic_block_forward.1
= control target key start
LH: loop header
LB: loop body
LE: loop exit
PB: predicated region body
PF: predicated region fallthrough
CT: control target
= control target key end

     0   :  { %s4384_s24 = smov 0   ;;  %s5245_s0 = inlined_call_operand.vmem [shape: bf16[2,36,16,4], index: 0, kind: input, shape index: {}]   ;;  %s5246_s1 = inlined_call_operand.vmem [shape: bf16[36,128], index: 1, kind: input, shape index: {}]   ;;  %s5247_s2 = inlined_call_operand.vmem [shape: bf16[1152,128], index: 2, kind: input, shape index: {}]   ;;  %s5248_s3 = inlined_call_operand.vmem [shape: bf16[4,128], index: 3, kind: input, shape index: {}]   ;;  %s5249_s4 = inlined_call_operand.vmem [shape: f32[2,128], index: 4, kind: input, shape index: {}]   ;;  %s5250_s5 = inlined_call_operand.vmem [shape: f32[2,128], index: 5, kind: input, shape index: {}]   ;;  %s5251_s6 = inlined_call_operand.vmem [shape: f32[2,128], index: 6, kind: input, shape index: {}]   ;;  %s5252_s7 = inlined_call_operand.vmem [shape: bf16[2,8,8,128], index: 7, kind: output, shape index: {}]  }
   0x1 LB: > { %s3459_s25 = sadd.s32 4294967295, %s4332_s24   ;;  %p3463_p0 = scmp.ge.s32.totalorder %s4332_s24, 1  ;;  %s4332_s24 = sphi %s4384_s24, %s17_s24  }
   0x2   : > { %p237_p1 = scmp.lt.s32.totalorder %s4332_s24, 3 }
   0x4   : > { %p238_p2 = pnand %p3463_p0, %p237_p1 }
   0x5   : > { %p269_p3 = scmp.lt.s32.totalorder (!%p238_p2), %s3459_s25, 1  ;;  %vm379_vm0 = vsmask.f32 (!%p238_p2), 3328  ;;  %vm380_vm1 = vsmask.f32 (!%p238_p2), 7440  ;;  %s4334_s30 = smov (!%p238_p2), 4  }
   0x6   : > { %241 = sbr.rel (%p238_p2) target bundleno = 768 (0x300), region = 48  ;;  %s4335_s8 = smov (!%p238_p2), 12   ;;  %vm4421_vm2 = vmor (!%p238_p2), %vm379_vm0, %vm380_vm1  ;;  %vm312_vm3 = vcmask (!%p238_p2), 31744   ;;  %vm1058_vm4 = vcmask (!%p238_p2), 1041408   ;;  %vm358_vm5 = vcmask (!%p238_p2), 64544   ;;  %vm518_vm6 = vcmask (!%p238_p2), 97344  }
   0x7   : > { %s4336_s9 = smov (!%p238_p2), 16   ;;  %s4337_s10 = smov (!%p238_p2), 8   ;;  %vm564_vm7 = vcmask (!%p238_p2), 130144   ;;  %vm610_vm8 = vcmask (!%p238_p2), 162944   ;;  %vm767_vm9 = vcmask (!%p238_p2), 195744   ;;  %vm813_vm10 = vcmask (!%p238_p2), 228544  }
   0x8   : > { %s4338_s13 = smov (!%p238_p2), 20   ;;  %s4339_s14 = smov (!%p238_p2), 24   ;;  %vm859_vm11 = vcmask (!%p238_p2), 261344   ;;  %vm1016_vm12 = vcmask (!%p238_p2), 294144   ;;  %vm1045_vm13 = vcmask (!%p238_p2), 293888   ;;  %vm1169_vm14 = vcmask (!%p238_p2), 1040384  }
   0x9   : > { %s4340_s17 = smov (!%p238_p2), 28   ;;  %s4341_s18 = smov (!%p238_p2), 32   ;;  %vm1170_vm15 = vsmask.f32 (!%p238_p2), 256  ;;  %vm1196_vm0 = vcmask (!%p238_p2), 1044484  }
   0xa   : > { %s4342_s21 = smov (!%p238_p2), 112   ;;  %vm4625_vm1 = vmand (!%p238_p2), %vm1169_vm14, %vm1170_vm15 }
   0xd   : > { %s5265_s25 = smov (!%p269_p3, %s3459_s25), 1 }
   0xe   : > { %s4099_s26 = smul.u32 288, %s5265_s25 }
  0x10   : > { %s4398_s29 = scalar_lea.vmem %s5245_s0, %s4099_s26 }
  0x11   : > { %v4118_v0 = vld [vmem:[%s4398_s29 + $0x48] ss:$8 sps:$4 sm:$0xff]   ;;  %v4120_v2 = vld [vmem:[%s4398_s29 + $0x58] ss:$8 sps:$4 sm:$0xff]   ;;  %v364_v6 = vld [vmem:[%s4398_s29 + $0x4] sm:$0x1] }
  0x12   : > { %v4119_v1 = vld [vmem:[%s4398_s29 + $0xa0] ss:$8 sps:$4 sm:$0xff]   ;;  %346 = vrot.lane.b32.xlu0 %v4118_v0, %s4334_s30  ;;  %v4122_v4 = vld [vmem:[%s4398_s29 + $0x90] ss:$8 sps:$4 sm:$0xff]   ;;  %v366_v8 = vld [vmem:[%s4398_s29 + $0xc] sm:$0x1] }
  0x13   : > { %554 = vrot.lane.b32.xlu1 %v4119_v1, %s4335_s8  ;;  %v4121_v3 = vld [vmem:[%s4398_s29 + $0xe8] ss:$8 sps:$4 sm:$0xff]   ;;  %v363_v5 = vld [vmem:[%s4398_s29] sm:$0xf]  ;;  %v392_v11 = vshll.u32 %v364_v6, 16  ;;  %v406_v14 = vshll.u32 %v366_v8, 16 }
  0x14   : > { %v365_v7 = vld [vmem:[%s4398_s29 + $0x8] sm:$0xf]  ;;  %v383_v9 = vshrl.u32 %v363_v5, 16  ;;  %v386_v10 = vshll.u32 %v363_v5, 16  ;;  %v4123_v19 = vld [vmem:[%s4398_s29 + $0xd8] ss:$8 sps:$4 sm:$0xff]  }
  0x15   : > { %v397_v12 = vshrl.u32 %v365_v7, 16  ;;  %v400_v13 = vshll.u32 %v365_v7, 16  ;;  %v394_v17 = vrot.slane %v392_v11, 5  ;;  %v408_v21 = vrot.slane %v406_v14, 5  ;;  %v367_v22 = vld [vmem:[%s4398_s29 + $0x10] sm:$0xf] }
  0x16   : > { %348 = vrot.lane.b32.xlu0 %v4120_v2, %s4334_s30  ;;  %v385_v15 = vrot.slane %v383_v9, 4  ;;  %v388_v16 = vrot.slane %v386_v10, 5  ;;  %v368_v23 = vld [vmem:[%s4398_s29 + $0x14] sm:$0x1]  ;;  %v369_v25 = vld [vmem:[%s4398_s29 + $0x18] sm:$0xf] }
  0x17   : > { %600 = vrot.lane.b32.xlu1 %v4121_v3, %s4336_s9  ;;  %v399_v18 = vrot.slane %v397_v12, 4  ;;  %v402_v20 = vrot.slane %v400_v13, 5  ;;  %v370_v26 = vld [vmem:[%s4398_s29 + $0x1c] sm:$0x1]  ;;  %v411_v27 = vshrl.u32 %v367_v22, 16  ;;  %v414_v28 = vshll.u32 %v367_v22, 16 }
  0x18   : > { %v389_v24 = vor.u32 %v388_v16, %v385_v15  ;;  %v420_v31 = vshll.u32 %v368_v23, 16  ;;  %v425_v32 = vshrl.u32 %v369_v25, 16  ;;  %v428_v33 = vshll.u32 %v369_v25, 16  ;;  %v3511_v34 = vld [vmem:[%s4398_s29 + $0x90] sm:$0xf] }
  0x19   : > { %v403_v30 = vor.u32 %v402_v20, %v399_v18  ;;  %v413_v36 = vrot.slane %v411_v27, 4  ;;  %v416_v37 = vrot.slane %v414_v28, 5  ;;  %v434_v38 = vshll.u32 %v370_v26, 16  ;;  %v3512_v39 = vld [vmem:[%s4398_s29 + $0x94] sm:$0x1] }
  0x1a   : > { %552 = vrot.lane.b32.xlu0 %v4122_v4, %s4335_s8  ;;  %v390_v35 = vrot.slane %v389_v24, 4  ;;  %v422_v41 = vrot.slane %v420_v31, 5  ;;  %v427_v42 = vrot.slane %v425_v32, 4  ;;  %v430_v43 = vrot.slane %v428_v33, 5  ;;  %v3513_v44 = vld [vmem:[%s4398_s29 + $0x98] sm:$0xf] }
  0x1b   : > { %v404_v40 = vrot.slane %v403_v30, 4  ;;  %v417_v46 = vor.u32 %v416_v37, %v413_v36  ;;  %v436_v47 = vrot.slane %v434_v38, 5  ;;  %v3514_v48 = vld [vmem:[%s4398_s29 + $0x9c] sm:$0x1]  ;;  %v632_v49 = vshrl.u32 %v3511_v34, 16 }
  0x1c   : > { %v395_v45 = vsel %vm4421_vm2, %v390_v35, %v394_v17  ;;  %v431_v51 = vor.u32 %v430_v43, %v427_v42  ;;  %v635_v52 = vshll.u32 %v3511_v34, 16  ;;  %v641_v53 = vshll.u32 %v3512_v39, 16  ;;  %v3515_v54 = vld [vmem:[%s4398_s29 + $0xa0] sm:$0xf]  ;;  %v3516_v55 = vld [vmem:[%s4398_s29 + $0xa4] sm:$0x1] }
  0x1d   : > { %v409_v50 = vsel %vm4421_vm2, %v404_v40, %v408_v21  ;;  %v418_v57 = vrot.slane %v417_v46, 4  ;;  %v634_v58 = vrot.slane %v632_v49, 4  ;;  %v646_v59 = vshrl.u32 %v3513_v44, 16  ;;  %v3517_v60 = vld [vmem:[%s4398_s29 + $0xa8] sm:$0xf]  ;;  %v4140_v42 = vld [vmem:[%s5246_s1] sm:$0xff]  }
  0x1e   : > { %598 = vrot.lane.b32.xlu0 %v4123_v19, %s4336_s9  ;;  %v3483_v56 = vcombine.low %v395_v45, %v409_v50  ;;  %v432_v61 = vrot.slane %v431_v51, 4  ;;  %v637_v62 = vrot.slane %v635_v52, 5  ;;  %v643_v63 = vrot.slane %v641_v53, 5  ;;  %v3518_v8 = vld [vmem:[%s4398_s29 + $0xac] sm:$0x1]  ;;  %4046 = vmatprep.subr.bf16.mxu0 %v4140_v42 }
  0x1f   : > { %v649_v0 = vshll.u32 %v3513_v44, 16  ;;  %v423_v1 = vsel %vm4421_vm2, %v418_v57, %v422_v41  ;;  %v648_v2 = vrot.slane %v646_v59, 4  ;;  %v655_v3 = vshll.u32 %v3514_v48, 16  ;;  %v3555_v30 = vld [vmem:[%s4398_s29 + $0x8] sm:$0xf]  ;;  %4047 = vmatpush3.bf16.msra.mxu0 %v4140_v42 }
  0x20   : > { %506 = vrot.lane.b32.xlu1 %v3483_v56, %s4337_s10  ;;  %v660_v4 = vshrl.u32 %v3515_v54, 16  ;;  %v437_v5 = vsel %vm4421_vm2, %v432_v61, %v436_v47  ;;  %v638_v6 = vor.u32 %v637_v62, %v634_v58  ;;  %v663_v9 = vshll.u32 %v3515_v54, 16  ;;  %v4124_v33 = vld [vmem:[%s4398_s29 + $0x8] ss:$8 sps:$4 sm:$0xff]   ;;  %v3556_v34 = vld [vmem:[%s4398_s29 + $0xc] sm:$0x1] }
  0x21   : > { %v651_v7 = vrot.slane %v649_v0, 5  ;;  %v3484_v10 = vcombine.low %v423_v1, %v437_v5  ;;  %v657_v11 = vrot.slane %v655_v3, 5  ;;  %v669_v13 = vshll.u32 %v3516_v55, 16  ;;  %v3557_v35 = vld [vmem:[%s4398_s29 + $0x10] sm:$0xf] }
  0x22   : > { %v662_v12 = vrot.slane %v660_v4, 4  ;;  %v639_v14 = vrot.slane %v638_v6, 4  ;;  %v665_v16 = vrot.slane %v663_v9, 5  ;;  %v674_v17 = vshrl.u32 %v3517_v60, 16  ;;  %v3558_v36 = vld [vmem:[%s4398_s29 + $0x14] sm:$0x1] }
  0x23   : > { %v652_v15 = vor.u32 %v651_v7, %v648_v2  ;;  %v671_v18 = vrot.slane %v669_v13, 5  ;;  %v677_v19 = vshll.u32 %v3517_v60, 16  ;;  %v683_v20 = vshll.u32 %v3518_v8, 16  ;;  %v3559_v41 = vld [vmem:[%s4398_s29 + $0x18] sm:$0xf]  ;;  %v4141_v4 = vld [vmem:[%s5246_s1 + $0x8] sm:$0xff]  }
  0x24   : > { %508 = vrot.lane.b32.xlu1 %v3484_v10, %s4337_s10  ;;  %v644_v21 = vsel %vm4421_vm2, %v639_v14, %v643_v63  ;;  %v666_v23 = vor.u32 %v665_v16, %v662_v12  ;;  %v676_v24 = vrot.slane %v674_v17, 4  ;;  %v881_v38 = vshrl.u32 %v3555_v30, 16  ;;  %v3560_v47 = vld [vmem:[%s4398_s29 + $0x1c] sm:$0x1]  ;;  %v3561_v51 = vld [vmem:[%s4398_s29 + $0x20] sm:$0xf]  ;;  %4048 = vmatprep.subr.bf16.mxu0 %v4141_v4 }
  0x25   : > { %v653_v22 = vrot.slane %v652_v15, 4  ;;  %v679_v25 = vrot.slane %v677_v19, 5  ;;  %v685_v28 = vrot.slane %v683_v20, 5  ;;  %v884_v39 = vshll.u32 %v3555_v30, 16  ;;  %v3562_v57 = vld [vmem:[%s4398_s29 + $0x24] sm:$0x1]  ;;  %4049 = vmatpush3.bf16.msra.mxu0 %v4141_v4 }
  0x26   : > { %v667_v27 = vrot.slane %v666_v23, 4  ;;  %v890_v40 = vshll.u32 %v3556_v34, 16  ;;  %v895_v44 = vshrl.u32 %v3557_v35, 16  ;;  %v898_v45 = vshll.u32 %v3557_v35, 16  ;;  %v4125_v59 = vld [vmem:[%s4398_s29 + $0x18] ss:$8 sps:$4 sm:$0xff]  }
  0x27   : > { %v658_v26 = vsel %vm4421_vm2, %v653_v22, %v657_v11  ;;  %v680_v32 = vor.u32 %v679_v25, %v676_v24  ;;  %v904_v46 = vshll.u32 %v3558_v36, 16  ;;  %v883_v48 = vrot.slane %v881_v38, 4  ;;  %v4126_v63 = vld [vmem:[%s4398_s29 + $0x50] ss:$8 sps:$4 sm:$0xff]   ;;  %v4127_v11 = vld [vmem:[%s4398_s29 + $0x60] ss:$8 sps:$4 sm:$0xff]  }
  0x28   : > { %v3527_v31 = vcombine.low %v644_v21, %v658_v26  ;;  %v672_v37 = vsel %vm4421_vm2, %v667_v27, %v671_v18  ;;  %v886_v49 = vrot.slane %v884_v39, 5  ;;  %v892_v50 = vrot.slane %v890_v40, 5  ;;  %v371_v16 = vld [vmem:[%s4398_s29 + $0x20] sm:$0xf]  ;;  %v372_v19 = vld [vmem:[%s4398_s29 + $0x24] sm:$0x1] }
  0x29   : > { %v681_v43 = vrot.slane %v680_v32, 4  ;;  %v909_v52 = vshrl.u32 %v3559_v41, 16  ;;  %v897_v54 = vrot.slane %v895_v44, 4  ;;  %v900_v55 = vrot.slane %v898_v45, 5  ;;  %v373_v20 = vld [vmem:[%s4398_s29 + $0x28] sm:$0xf] }
  0x2a   : > { %755 = vrot.lane.b32.xlu0 %v3527_v31, %s4338_s13  ;;  %v906_v56 = vrot.slane %v904_v46, 5  ;;  %v887_v60 = vor.u32 %v886_v49, %v883_v48  ;;  %v912_v62 = vshll.u32 %v3559_v41, 16  ;;  %v918_v1 = vshll.u32 %v3560_v47, 16  ;;  %v374_v21 = vld [vmem:[%s4398_s29 + $0x2c] sm:$0x1] }
  0x2b   : > { %v686_v53 = vsel %vm4421_vm2, %v681_v43, %v685_v28  ;;  %v911_v61 = vrot.slane %v909_v52, 4  ;;  %v901_v0 = vor.u32 %v900_v55, %v897_v54  ;;  %v923_v2 = vshrl.u32 %v3561_v51, 16  ;;  %v375_v26 = vld [vmem:[%s4398_s29 + $0x30] sm:$0xf]  ;;  %v377_v38 = vld [vmem:[%s4398_s29 + $0x38] sm:$0xf] }
  0x2c   : > { %v3528_v58 = vcombine.low %v672_v37, %v686_v53  ;;  %v926_v3 = vshll.u32 %v3561_v51, 16  ;;  %v888_v5 = vrot.slane %v887_v60, 4  ;;  %v914_v6 = vrot.slane %v912_v62, 5  ;;  %v4128_v28 = vld [vmem:[%s4398_s29 + $0x68] ss:$8 sps:$4 sm:$0xff]  }
  0x2d   : > { %v932_v7 = vshll.u32 %v3562_v57, 16  ;;  %v902_v8 = vrot.slane %v901_v0, 4  ;;  %v925_v9 = vrot.slane %v923_v2, 4  ;;  %v920_v14 = vrot.slane %v918_v1, 5  ;;  %v378_v43 = vld [vmem:[%s4398_s29 + $0x3c] sm:$0x1] }
  0x2e   : > { %801 = vrot.lane.b32.xlu0 %v4124_v33, %s4339_s14  ;;  %757 = vrot.lane.b32.xlu1 %v3528_v58, %s4338_s13  ;;  %v928_v10 = vrot.slane %v926_v3, 5  ;;  %v893_v12 = vsel %vm4421_vm2, %v888_v5, %v892_v50  ;;  %v915_v13 = vor.u32 %v914_v6, %v911_v61  ;;  %v439_v24 = vshrl.u32 %v371_v16, 16  ;;  %v376_v33 = vld [vmem:[%s4398_s29 + $0x34] sm:$0x1]  ;;  %v4130_v4 = vld [vmem:[%s4398_s29 + $0xb0] ss:$8 sps:$4 sm:$0xff]  }
  0x2f   : > { %v934_v15 = vrot.slane %v932_v7, 5  ;;  %v907_v17 = vsel %vm4421_vm2, %v902_v8, %v906_v56  ;;  %v442_v25 = vshll.u32 %v371_v16, 16  ;;  %v448_v30 = vshll.u32 %v372_v19, 16  ;;  %v3519_v5 = vld [vmem:[%s4398_s29 + $0xb0] sm:$0xf] }
  0x30   : > { %v929_v18 = vor.u32 %v928_v10, %v925_v9  ;;  %v3571_v22 = vcombine.low %v893_v12, %v907_v17  ;;  %v916_v23 = vrot.slane %v915_v13, 4  ;;  %v453_v31 = vshrl.u32 %v373_v20, 16  ;;  %v3520_v7 = vld [vmem:[%s4398_s29 + $0xb4] sm:$0x1]  ;;  %v3521_v8 = vld [vmem:[%s4398_s29 + $0xb8] sm:$0xf] }
  0x31   : > { %v456_v32 = vshll.u32 %v373_v20, 16  ;;  %v441_v35 = vrot.slane %v439_v24, 4  ;;  %v444_v36 = vrot.slane %v442_v25, 5  ;;  %v462_v37 = vshll.u32 %v374_v21, 16  ;;  %v3523_v19 = vld [vmem:[%s4398_s29 + $0xc0] sm:$0xf] }
  0x32   : > { %847 = vrot.lane.b32.xlu0 %v4126_v63, %s4340_s17  ;;  %803 = vrot.lane.b32.xlu1 %v4125_v59, %s4339_s14  ;;  %v930_v27 = vrot.slane %v929_v18, 4  ;;  %v921_v34 = vsel %vm4421_vm2, %v916_v23, %v920_v14  ;;  %v450_v40 = vrot.slane %v448_v30, 5  ;;  %v455_v41 = vrot.slane %v453_v31, 4  ;;  %v4129_v59 = vld [vmem:[%s4398_s29 + $0x78] ss:$8 sps:$4 sm:$0xff]  }
  0x33   : > { %v458_v42 = vrot.slane %v456_v32, 5  ;;  %v445_v45 = vor.u32 %v444_v36, %v441_v35  ;;  %v464_v46 = vrot.slane %v462_v37, 5  ;;  %v467_v47 = vshrl.u32 %v375_v26, 16  ;;  %v4132_v21 = vld [vmem:[%s4398_s29 + $0xf8] ss:$8 sps:$4 sm:$0xff]  }
  0x34   : > { %v935_v39 = vsel %vm4421_vm2, %v930_v27, %v934_v15  ;;  %v470_v49 = vshll.u32 %v375_v26, 16  ;;  %v476_v50 = vshll.u32 %v376_v33, 16  ;;  %v481_v51 = vshrl.u32 %v377_v38, 16  ;;  %v3524_v25 = vld [vmem:[%s4398_s29 + $0xc4] sm:$0x1] }
  0x35   : > { %v3572_v44 = vcombine.low %v921_v34, %v935_v39  ;;  %v459_v48 = vor.u32 %v458_v42, %v455_v41  ;;  %v446_v52 = vrot.slane %v445_v45, 4  ;;  %v469_v53 = vrot.slane %v467_v47, 4  ;;  %v4131_v27 = vld [vmem:[%s4398_s29 + $0xc0] ss:$8 sps:$4 sm:$0xff]   ;;  %v3526_v32 = vld [vmem:[%s4398_s29 + $0xcc] sm:$0x1] }
  0x36   : > { %1004 = vrot.lane.b32.xlu0 %v3571_v22, %s4341_s18  ;;  %849 = vrot.lane.b32.xlu1 %v4127_v11, %s4340_s17  ;;  %v484_v54 = vshll.u32 %v377_v38, 16  ;;  %v490_v55 = vshll.u32 %v378_v43, 16  ;;  %v472_v57 = vrot.slane %v470_v49, 5  ;;  %v483_v58 = vrot.slane %v481_v51, 4  ;;  %v3522_v11 = vld [vmem:[%s4398_s29 + $0xbc] sm:$0x1] }
  0x37   : > { %v460_v56 = vrot.slane %v459_v48, 4  ;;  %v451_v60 = vsel %vm4421_vm2, %v446_v52, %v450_v40  ;;  %v478_v0 = vrot.slane %v476_v50, 5  ;;  %v688_v9 = vshrl.u32 %v3519_v5, 16  ;;  %v3525_v31 = vld [vmem:[%s4398_s29 + $0xc8] sm:$0xf] }
  0x38   : > { %v486_v61 = vrot.slane %v484_v54, 5  ;;  %v473_v63 = vor.u32 %v472_v57, %v469_v53  ;;  %v492_v3 = vrot.slane %v490_v55, 5  ;;  %v691_v12 = vshll.u32 %v3519_v5, 16  ;;  %v3567_v5 = vld [vmem:[%s4398_s29 + $0x38] sm:$0xf] }
  0x39   : > { %v465_v62 = vsel %vm4421_vm2, %v460_v56, %v464_v46  ;;  %v697_v13 = vshll.u32 %v3520_v7, 16  ;;  %v702_v14 = vshrl.u32 %v3521_v8, 16  ;;  %v690_v16 = vrot.slane %v688_v9, 4  ;;  %v4134_v56 = vld [vmem:[%s4398_s29 + $0x28] ss:$8 sps:$4 sm:$0xff]  }
  0x3a   : > { %350 = vrot.lane.b32.xlu0 %v4128_v28, %s4334_s30  ;;  %1006 = vrot.lane.b32.xlu1 %v3572_v44, %s4341_s18  ;;  %v3485_v1 = vcombine.low %v451_v60, %v465_v62  ;;  %v487_v2 = vor.u32 %v486_v61, %v483_v58  ;;  %v474_v6 = vrot.slane %v473_v63, 4  ;;  %v705_v17 = vshll.u32 %v3521_v8, 16  ;;  %v4133_v44 = vld [vmem:[%s4398_s29 + $0x108] ss:$8 sps:$4 sm:$0xff]   ;;  %v3566_v62 = vld [vmem:[%s4398_s29 + $0x34] sm:$0x1] }
  0x3b   : > { %v711_v18 = vshll.u32 %v3522_v11, 16  ;;  %v693_v22 = vrot.slane %v691_v12, 5  ;;  %v699_v23 = vrot.slane %v697_v13, 5  ;;  %v704_v24 = vrot.slane %v702_v14, 4  ;;  %v3563_v58 = vld [vmem:[%s4398_s29 + $0x28] sm:$0xf] }
  0x3c   : > { %v488_v10 = vrot.slane %v487_v2, 4  ;;  %v479_v15 = vsel %vm4421_vm2, %v474_v6, %v478_v0  ;;  %v707_v28 = vrot.slane %v705_v17, 5  ;;  %v716_v34 = vshrl.u32 %v3523_v19, 16  ;;  %v3565_v61 = vld [vmem:[%s4398_s29 + $0x30] sm:$0xf] }
  0x3d   : > { %v713_v30 = vrot.slane %v711_v18, 5  ;;  %v694_v33 = vor.u32 %v693_v22, %v690_v16  ;;  %v719_v35 = vshll.u32 %v3523_v19, 16  ;;  %v725_v36 = vshll.u32 %v3524_v25, 16  ;;  %v4136_v7 = vld [vmem:[%s4398_s29 + $0x70] ss:$8 sps:$4 sm:$0xff]  }
  0x3e   : > { %352 = vrot.lane.b32.xlu1 %v4129_v59, %s4334_s30  ;;  %510 = vrot.lane.b32.xlu0 %v3485_v1, %s4337_s10  ;;  %v493_v20 = vsel %vm4421_vm2, %v488_v10, %v492_v3  ;;  %v708_v37 = vor.u32 %v707_v28, %v704_v24  ;;  %v730_v38 = vshrl.u32 %v3525_v31, 16  ;;  %v733_v39 = vshll.u32 %v3525_v31, 16  ;;  %v3564_v59 = vld [vmem:[%s4398_s29 + $0x2c] sm:$0x1]  ;;  %v3568_v11 = vld [vmem:[%s4398_s29 + $0x3c] sm:$0x1] }
  0x3f   : > { %v3486_v26 = vcombine.low %v479_v15, %v493_v20  ;;  %v739_v40 = vshll.u32 %v3526_v32, 16  ;;  %v695_v41 = vrot.slane %v694_v33, 4  ;;  %v718_v42 = vrot.slane %v716_v34, 4  ;;  %v4135_v12 = vld [vmem:[%s4398_s29 + $0x38] ss:$8 sps:$4 sm:$0xff]  }
  0x40   : > { %v721_v43 = vrot.slane %v719_v35, 5  ;;  %v709_v45 = vrot.slane %v708_v37, 4  ;;  %v732_v46 = vrot.slane %v730_v38, 4  ;;  %v735_v47 = vrot.slane %v733_v39, 5  ;;  %v3569_v16 = vld [vmem:[%s4398_s29 + $0x40] sm:$0xf] }
  0x41   : > { %v700_v48 = vsel %vm4421_vm2, %v695_v41, %v699_v23  ;;  %v727_v50 = vrot.slane %v725_v36, 5  ;;  %v741_v53 = vrot.slane %v739_v40, 5  ;;  %v937_v63 = vshrl.u32 %v3563_v58, 16  ;;  %v3570_v20 = vld [vmem:[%s4398_s29 + $0x44] sm:$0x1] }
  0x42   : > { %556 = vrot.lane.b32.xlu0 %v4130_v4, %s4335_s8  ;;  %512 = vrot.lane.b32.xlu1 %v3486_v26, %s4337_s10  ;;  %v722_v49 = vor.u32 %v721_v43, %v718_v42  ;;  %v714_v51 = vsel %vm4421_vm2, %v709_v45, %v713_v30  ;;  %v736_v52 = vor.u32 %v735_v47, %v732_v46  ;;  %v940_v0 = vshll.u32 %v3563_v58, 16  ;;  %v4137_v31 = vld [vmem:[%s4398_s29 + $0x80] ss:$8 sps:$4 sm:$0xff]   ;;  %v4139_v42 = vld [vmem:[%s4398_s29 + $0x10] ss:$8 sps:$4 sm:$0xff]  }
  0x43   : > { %v3529_v54 = vcombine.low %v700_v48, %v714_v51  ;;  %v946_v2 = vshll.u32 %v3564_v59, 16  ;;  %v951_v3 = vshrl.u32 %v3565_v61, 16  ;;  %v954_v4 = vshll.u32 %v3565_v61, 16  ;;  %v4138_v35 = vld [vmem:[%s4398_s29] ss:$8 sps:$4 sm:$0xff]   ;;  %314 = vst.msk [vmem:[#allocation2 + $0x8] sm:$0xff] %vm312_vm3, %v4139_v42 }
  0x44   : > { %v723_v55 = vrot.slane %v722_v49, 4  ;;  %v737_v57 = vrot.slane %v736_v52, 4  ;;  %v939_v8 = vrot.slane %v937_v63, 4  ;;  %v942_v9 = vrot.slane %v940_v0, 5  ;;  %313 = vst.msk [vmem:[#allocation2] sm:$0xff] %vm312_vm3, %v4138_v35  ;;  %v4150_v42 = vld [vmem:[%s5247_s2] sm:$0xff]  }
  0x45   : > { %v960_v10 = vshll.u32 %v3566_v62, 16  ;;  %v948_v13 = vrot.slane %v946_v2, 5  ;;  %v953_v14 = vrot.slane %v951_v3, 4  ;;  %v956_v15 = vrot.slane %v954_v4, 5  ;;  %v4142_v45 = vld [vmem:[%s4398_s29 + $0x20] ss:$8 sps:$4 sm:$0xff]  }
  0x46   : > { %602 = vrot.lane.b32.xlu0 %v4132_v21, %s4336_s9  ;;  %558 = vrot.lane.b32.xlu1 %v4131_v27, %s4335_s8  ;;  %v728_v60 = vsel %vm4421_vm2, %v723_v55, %v727_v50  ;;  %v742_v1 = vsel %vm4421_vm2, %v737_v57, %v741_v53  ;;  %v965_v17 = vshrl.u32 %v3567_v5, 16  ;;  %v943_v18 = vor.u32 %v942_v9, %v939_v8  ;;  %v4143_v47 = vld [vmem:[%s4398_s29 + $0x30] ss:$8 sps:$4 sm:$0xff]   ;;  %v4765_v35 = vld [vmem:[%s5249_s4 + $0x1] ss:$0 sm:$0xff] }
  0x47   : > { %v3530_v6 = vcombine.low %v728_v60, %v742_v1  ;;  %v962_v19 = vrot.slane %v960_v10, 5  ;;  %v968_v21 = vshll.u32 %v3567_v5, 16  ;;  %v974_v22 = vshll.u32 %v3568_v11, 16  ;;  %315 = vst.msk [vmem:[#allocation2 + $0x10] sm:$0xff] %vm312_vm3, %v4142_v45  ;;  %316 = vst.msk [vmem:[#allocation2 + $0x18] sm:$0xff] %vm312_vm3, %v4143_v47 }
  0x48   : > { %v957_v23 = vor.u32 %v956_v15, %v953_v14  ;;  %v967_v24 = vrot.slane %v965_v17, 4  ;;  %v979_v25 = vshrl.u32 %v3569_v16, 16  ;;  %v982_v26 = vshll.u32 %v3569_v16, 16  ;;  %v4144_v49 = vld [vmem:[%s5246_s1 + $0x10] ss:$0 sps:$4 sm:$0x33]  }
  0x49   : > { %v944_v27 = vrot.slane %v943_v18, 4  ;;  %v970_v28 = vrot.slane %v968_v21, 5  ;;  %v988_v30 = vshll.u32 %v3570_v20, 16  ;;  %v976_v38 = vrot.slane %v974_v22, 5  ;;  %4096 = vmatprep.subr.msk.bf16.mxu0 %vm1058_vm4, %v4144_v49  ;;  %v1175_v45 = vld [vmem:[#allocation3 + $0x10] sm:$0x1] }
  0x4a   : > { %759 = vrot.lane.b32.xlu0 %v3529_v54, %s4338_s13  ;;  %604 = vrot.lane.b32.xlu1 %v4133_v44, %s4336_s9  ;;  %v958_v32 = vrot.slane %v957_v23, 4  ;;  %v981_v33 = vrot.slane %v979_v25, 4  ;;  %v984_v34 = vrot.slane %v982_v26, 5  ;;  %v1060_v52 = vsel %vm1058_vm4, %v4144_v49, 0  ;;  %v4145_v25 = vld [vmem:[%s5247_s2 + $0xc0] sm:$0xff]  }
  0x4b   : > { %v949_v36 = vsel %vm4421_vm2, %v944_v27, %v948_v13  ;;  %v971_v37 = vor.u32 %v970_v28, %v967_v24  ;;  %v990_v39 = vrot.slane %v988_v30, 5  ;;  %4051 = vmatpush3.bf16.msra.mxu0 %v1060_v52  ;;  %v4146_v26 = vld [vmem:[%s5247_s2 + $0x80] sm:$0xff]   ;;  %v4147_v27 = vld [vmem:[%s5247_s2 + $0xc8] sm:$0xff]   ;;  %v1178_v30 = vld [vmem:[#allocation3 + $0x18] sm:$0x1] }
  0x4c   : > { %v963_v40 = vsel %vm4421_vm2, %v958_v32, %v962_v19  ;;  %v985_v41 = vor.u32 %v984_v34, %v981_v33  ;;  %3909 = vmatprep.subr.bf16.mxu0 %v4145_v25  ;;  %v4148_v28 = vld [vmem:[%s5247_s2 + $0x88] sm:$0xff]   ;;  %v1205_v32 = vld [vmem:[#allocation3 + $0x18] sm:$0x10]  ;;  %v4149_v33 = vld [vmem:[%s5247_s2 + $0x40] sm:$0xff]   ;;  %v1179_v34 = vsel %vm4625_vm1, 0, %v1178_v30 }
  0x4d   : > { %v3573_v43 = vcombine.low %v949_v36, %v963_v40  ;;  %v972_v44 = vrot.slane %v971_v37, 4  ;;  %v1172_v36 = vld [vmem:[#allocation3 + $0x8] sm:$0x1]  ;;  %v1199_v37 = vld [vmem:[#allocation3 + $0x8] sm:$0x10]  ;;  %3869 = vmatprep.subr.bf16.mxu1 %v4149_v33  ;;  %v4197_v30 = vld [vmem:[%s5247_s2 + $0x1c0] sm:$0xff]  }
  0x4e   : > { %805 = vrot.lane.b32.xlu0 %v4134_v56, %s4339_s14  ;;  %761 = vrot.lane.b32.xlu1 %v3530_v6, %s4338_s13  ;;  %v986_v46 = vrot.slane %v985_v41, 4  ;;  %1180 = vst [vmem:[#allocation3 + $0x18] sm:$0x1] %v1179_v34  ;;  %v1181_v41 = vld [vmem:[#allocation3 + $0x20] sm:$0x1] }
  0x4f   : > { %v977_v48 = vsel %vm4421_vm2, %v972_v44, %v976_v38  ;;  %v1208_v44 = vld [vmem:[#allocation3 + $0x20] sm:$0x10]  ;;  %v1202_v49 = vld [vmem:[#allocation3 + $0x10] sm:$0x10]  ;;  %3870 = vmatpush3.bf16.msra.mxu1 %v4150_v42  ;;  %v1187_v25 = vld [vmem:[#allocation3 + $0x30] sm:$0x1] }
  0x50   : > { %v991_v50 = vsel %vm4421_vm2, %v986_v46, %v990_v39  ;;  %v1173_v39 = vsel %vm4625_vm1, 0, %v1172_v36  ;;  %v4151_v46 = vld [vmem:[%s5247_s2 + $0xd0] sm:$0xff]  }
  0x51   : > { %v3574_v51 = vcombine.low %v977_v48, %v991_v50  ;;  %1174 = vst [vmem:[#allocation3 + $0x8] sm:$0x1] %v1173_v39  ;;  %v1176_v48 = vsel %vm4625_vm1, 0, %v1175_v45  ;;  %v4152_v50 = vld [vmem:[%s5247_s2 + $0x90] sm:$0xff]  }
  0x52   : > { %851 = vrot.lane.b32.xlu0 %v4136_v7, %s4340_s17  ;;  %807 = vrot.lane.b32.xlu1 %v4135_v12, %s4339_s14  ;;  %1177 = vst [vmem:[#allocation3 + $0x10] sm:$0x1] %v1176_v48  ;;  %s3830_s14 = sshll.u32 %s5265_s25, 5 }
  0x56   : > { %1008 = vrot.lane.b32.xlu0 %v3573_v43, %s4341_s18  ;;  %853 = vrot.lane.b32.xlu1 %v4137_v31, %s4340_s17  ;;  %v1182_v43 = vsel %vm4625_vm1, 0, %v1181_v41  ;;  %v4758_v31 = vld [vmem:[%s5249_s4] ss:$0 sm:$0xff]  ;;  %s5228_s17 = scalar_lea.vmem %s5252_s7, %s3830_s14 }
  0x57   : > { %1183 = vst [vmem:[#allocation3 + $0x20] sm:$0x1] %v1182_v43 }
  0x5a   : > { %1010 = vrot.lane.b32.xlu1 %v3574_v51, %s4341_s18  ;;  %v4153_v51 = vld [vmem:[%s5247_s2 + $0x48] sm:$0xff]  }
  0x5b   : > { %3871 = vmatprep.subr.bf16.mxu1 %v4153_v51 }
  0x84   : > { %v347_v53 = vpop.permute.xlu0 %346 }
  0x85   : > { %359 = vst.msk [vmem:[#allocation2] sm:$0xff] %vm358_vm5, %v347_v53  ;;  %v555_v54 = vpop.permute.xlu1 %554  ;;  %v4154_v53 = vld [vmem:[%s5247_s2 + $0x8] sm:$0xff]  }
  0x86   : > { %3872 = vmatpush3.bf16.msra.mxu1 %v4154_v53 }
  0x88   : > { %v349_v55 = vpop.permute.xlu0 %348 }
  0x89   : > { %360 = vst.msk [vmem:[#allocation2 + $0x8] sm:$0xff] %vm358_vm5, %v349_v55  ;;  %v601_v56 = vpop.permute.xlu1 %600  ;;  %v4156_v55 = vld [vmem:[%s5247_s2 + $0x98] sm:$0xff]  }
  0x8c   : > { %v553_v57 = vpop.permute.xlu0 %552 }
  0x90   : > { %v599_v59 = vpop.permute.xlu0 %598 }
  0x92   : > { %v507_v58 = vpop.permute.xlu1 %506 }
  0x93   : > { %519 = vst.msk [vmem:[#allocation2] sm:$0xff] %vm518_vm6, %v507_v58  ;;  %v4159_v58 = vld [vmem:[%s5247_s2 + $0xe0] sm:$0xff]  }
  0x94   : > { %565 = vst.msk [vmem:[#allocation2] sm:$0xff] %vm564_vm7, %v553_v57  ;;  %v4158_v57 = vld [vmem:[%s5247_s2 + $0x10] sm:$0xff]  }
  0x95   : > { %611 = vst.msk [vmem:[#allocation2] sm:$0xff] %vm610_vm8, %v599_v59  ;;  %v4160_v59 = vld [vmem:[%s5247_s2 + $0xa0] sm:$0xff]  }
  0x96   : > { %v509_v60 = vpop.permute.xlu1 %508 }
  0x97   : > { %520 = vst.msk [vmem:[#allocation2 + $0x8] sm:$0xff] %vm518_vm6, %v509_v60  ;;  %v4161_v60 = vld [vmem:[%s5247_s2 + $0x58] sm:$0xff]  }
  0x98   : > { %566 = vst.msk [vmem:[#allocation2 + $0x8] sm:$0xff] %vm564_vm7, %v555_v54  ;;  %v4155_v54 = vld [vmem:[%s5247_s2 + $0xd8] sm:$0xff]  }
  0x99   : > { %612 = vst.msk [vmem:[#allocation2 + $0x8] sm:$0xff] %vm610_vm8, %v601_v56  ;;  %v4157_v56 = vld [vmem:[%s5247_s2 + $0x50] sm:$0xff]  }
  0x9a   : > { %3873 = vmatprep.subr.bf16.mxu1 %v4157_v56 }
  0x9b   : > { %3874 = vmatpush3.bf16.msra.mxu1 %v4158_v57 }
  0x9c   : > { %v756_v61 = vpop.permute.xlu0 %755  ;;  %3875 = vmatprep.subr.bf16.mxu1 %v4161_v60 }
  0x9d   : > { %768 = vst.msk [vmem:[#allocation2] sm:$0xff] %vm767_vm9, %v756_v61  ;;  %v4343_v61 = vmov 0  }
  0x9e   : > { %1165 = vst [vmem:[#allocation3] sm:$0xff] %v4343_v61  ;;  %1167 = vst [vmem:[#allocation3 + $0x48] sm:$0xff] %v4343_v61 }
  0xa0   : > { %v802_v62 = vpop.permute.xlu0 %801  ;;  %v758_v63 = vpop.permute.xlu1 %757 }
  0xa1   : > { %814 = vst.msk [vmem:[#allocation2] sm:$0xff] %vm813_vm10, %v802_v62  ;;  %v4162_v62 = vld [vmem:[%s5247_s2 + $0x18] sm:$0xff]  }
  0xa2   : > { %769 = vst.msk [vmem:[#allocation2 + $0x8] sm:$0xff] %vm767_vm9, %v758_v63  ;;  %v4163_v63 = vld [vmem:[%s5247_s2 + $0xe8] sm:$0xff]   ;;  %3876 = vmatpush3.bf16.msra.mxu1 %v4162_v62 }
  0xa4   : > { %v848_v0 = vpop.permute.xlu0 %847  ;;  %v804_v1 = vpop.permute.xlu1 %803 }
  0xa5   : > { %860 = vst.msk [vmem:[#allocation2] sm:$0xff] %vm859_vm11, %v848_v0  ;;  %v4164_v0 = vld [vmem:[%s5247_s2 + $0xa8] sm:$0xff]   ;;  %v4760_v33 = vld [vmem:[#allocation3] sm:$0x1f] }
  0xa6   : > { %815 = vst.msk [vmem:[#allocation2 + $0x8] sm:$0xff] %vm813_vm10, %v804_v1  ;;  %v4165_v1 = vld [vmem:[%s5247_s2 + $0x60] sm:$0xff]   ;;  %v4771_v41 = vld [vmem:[#allocation3 + $0x48] sm:$0x1f]  ;;  %v3597_v60 = vcombine.high %v4760_v33, %v4760_v33 }
  0xa7   : > { %3877 = vmatprep.subr.bf16.mxu1 %v4165_v1 }
  0xa8   : > { %v1005_v2 = vpop.permute.xlu0 %1004  ;;  %v850_v3 = vpop.permute.xlu1 %849 }
  0xa9   : > { %1017 = vst.msk [vmem:[#allocation2] sm:$0xff] %vm1016_vm12, %v1005_v2  ;;  %v4167_v2 = vld [vmem:[%s5247_s2 + $0xf0] sm:$0xff]  }
  0xaa   : > { %861 = vst.msk [vmem:[#allocation2 + $0x8] sm:$0xff] %vm859_vm11, %v850_v3  ;;  %v4166_v3 = vld [vmem:[%s5247_s2 + $0x20] sm:$0xff]  }
  0xab   : > { %3878 = vmatpush3.bf16.msra.mxu1 %v4166_v3 }
  0xac   : > { %v351_v4 = vpop.permute.xlu0 %350  ;;  %v1007_v5 = vpop.permute.xlu1 %1006 }
  0xad   : > { %361 = vst.msk [vmem:[#allocation2 + $0x10] sm:$0xff] %vm358_vm5, %v351_v4  ;;  %v4169_v4 = vld [vmem:[%s5247_s2 + $0x68] sm:$0xff]  }
  0xae   : > { %1018 = vst.msk [vmem:[#allocation2 + $0x8] sm:$0xff] %vm1016_vm12, %v1007_v5  ;;  %v4168_v5 = vld [vmem:[%s5247_s2 + $0xb0] sm:$0xff]   ;;  %3879 = vmatprep.subr.bf16.mxu1 %v4169_v4 }
  0xb0   : > { %v3249_v6 = vld [vmem:[#allocation2] sm:$0xff]  ;;  %v353_v7 = vpop.permute.xlu1 %352  ;;  %v511_v8 = vpop.permute.xlu0 %510 }
  0xb1   : > { %3258 = vrot.lane.b32.xlu0 %v3249_v6, %s4342_s21  ;;  %4052 = vmatprep.mubr.msk.bf16.mxu0 %vm1045_vm13, %v3249_v6  ;;  %362 = vst.msk [vmem:[#allocation2 + $0x18] sm:$0xff] %vm358_vm5, %v353_v7  ;;  %vm1197_vm5 = vsmask.f32 7954  ;;  %v4171_v6 = vld [vmem:[%s5247_s2 + $0xf8] sm:$0xff]   ;;  %v4170_v7 = vld [vmem:[%s5247_s2 + $0x28] sm:$0xff]  }
  0xb2   : > { %521 = vst.msk [vmem:[#allocation2 + $0x10] sm:$0xff] %vm518_vm6, %v511_v8  ;;  %v4172_v8 = vld [vmem:[%s5247_s2 + $0xb8] sm:$0xff]   ;;  %3880 = vmatpush3.bf16.msra.mxu1 %v4170_v7 }
  0xb4   : > { %v557_v10 = vpop.permute.xlu0 %556  ;;  %v513_v11 = vpop.permute.xlu1 %512 }
  0xb5   : > { %v1022_v9 = vld [vmem:[#allocation2 + $0x8] sm:$0xff]  ;;  %567 = vst.msk [vmem:[#allocation2 + $0x10] sm:$0xff] %vm564_vm7, %v557_v10  ;;  %v4175_v10 = vld [vmem:[%s5247_s2 + $0x30] sm:$0xff]  }
  0xb6   : > { %4053 = vmatmul.mubr.msk.bf16.vlgmr.msra.gmra.mrb[0].mxu0 %vm1045_vm13, %v1022_v9  ;;  %3260 = vrot.lane.b32.xlu0 %v1022_v9, %s4342_s21  ;;  %522 = vst.msk [vmem:[#allocation2 + $0x18] sm:$0xff] %vm518_vm6, %v513_v11  ;;  %vm4634_vm6 = vmand %vm1196_vm0, %vm1197_vm5  ;;  %v4174_v9 = vld [vmem:[%s5247_s2 + $0x70] sm:$0xff]   ;;  %v4181_v11 = vld [vmem:[%s5247_s2 + $0x78] sm:$0xff]  }
  0xb7   : > { %3910 = vmatpush3.bf16.msra.mxu0 %v4146_v26  ;;  %v1206_v38 = vsel %vm4634_vm6, 0, %v1205_v32  ;;  %v1200_v40 = vsel %vm4634_vm6, 0, %v1199_v37  ;;  %v1209_v47 = vsel %vm4634_vm6, 0, %v1208_v44  ;;  %v1203_v52 = vsel %vm4634_vm6, 0, %v1202_v49  ;;  %3881 = vmatprep.subr.bf16.mxu1 %v4174_v9  ;;  %v1214_v26 = vld [vmem:[#allocation3 + $0x30] sm:$0x10] }
  0xb8   : > { %v603_v12 = vpop.permute.xlu0 %602  ;;  %v559_v13 = vpop.permute.xlu1 %558  ;;  %3911 = vmatprep.subr.bf16.mxu0 %v4147_v27  ;;  %1207 = vst [vmem:[#allocation3 + $0x18] sm:$0x10] %v1206_v38  ;;  %1201 = vst [vmem:[#allocation3 + $0x8] sm:$0x10] %v1200_v40  ;;  %3882 = vmatpush3.bf16.msra.mxu1 %v4175_v10  ;;  %v1188_v27 = vsel %vm4625_vm1, 0, %v1187_v25  ;;  %v4201_v32 = vld [vmem:[%s5247_s2 + $0x140] sm:$0xff]   ;;  %v3596_v40 = vcombine.low %v4760_v33, %v4760_v33  ;;  %v3714_v49 = vcombine.low %v4771_v41, %v4771_v41 }
  0xb9   : > { %613 = vst.msk [vmem:[#allocation2 + $0x10] sm:$0xff] %vm610_vm8, %v603_v12  ;;  %1210 = vst [vmem:[#allocation3 + $0x20] sm:$0x10] %v1209_v47  ;;  %v4182_v12 = vld [vmem:[%s5247_s2 + $0x38] sm:$0xff]   ;;  %3883 = vmatprep.subr.bf16.mxu1 %v4181_v11  ;;  %v1550_v11 = vld [vmem:[#allocation3] sm:$0x1e] }
  0xba   : > { %568 = vst.msk [vmem:[#allocation2 + $0x18] sm:$0xff] %vm564_vm7, %v559_v13  ;;  %1204 = vst [vmem:[#allocation3 + $0x10] sm:$0x10] %v1203_v52  ;;  %v1190_v13 = vld [vmem:[#allocation3 + $0x38] sm:$0x1]  ;;  %v1419_v52 = vshrl.u32 %v3596_v40, 16 }
  0xbb   : > { %3912 = vmatpush3.bf16.msra.mxu0 %v4148_v28  ;;  %v1215_v28 = vsel %vm4634_vm6, 0, %v1214_v26  ;;  %1189 = vst [vmem:[#allocation3 + $0x30] sm:$0x1] %v1188_v27  ;;  %vm1307_vm7 = vcmask 1044480   ;;  %v2153_v61 = vshrl.u32 %v3714_v49, 16  ;;  %v2156_v1 = vshll.u32 %v3714_v49, 16 }
  0xbc   : > { %v760_v14 = vpop.permute.xlu0 %759  ;;  %v605_v15 = vpop.permute.xlu1 %604  ;;  %3913 = vmatprep.subr.bf16.mxu0 %v4151_v46  ;;  %3884 = vmatpush3.bf16.msra.mxu1 %v4182_v12  ;;  %1216 = vst [vmem:[#allocation3 + $0x30] sm:$0x10] %v1215_v28  ;;  %v3715_v12 = vcombine.high %v4771_v41, %v4771_v41  ;;  %v3616_v26 = vcombine.low %v1550_v11, %v1550_v11  ;;  %v1428_v33 = vshll.u32 %v3597_v60, 16 }
  0xbd   : > { %770 = vst.msk [vmem:[#allocation2 + $0x10] sm:$0xff] %vm767_vm9, %v760_v14  ;;  %v1217_v14 = vld [vmem:[#allocation3 + $0x38] sm:$0x10]  ;;  %3949 = vmatprep.subr.bf16.mxu1 %v4201_v32  ;;  %v3617_v27 = vcombine.high %v1550_v11, %v1550_v11 }
  0xbe   : > { %614 = vst.msk [vmem:[#allocation2 + $0x18] sm:$0xff] %vm610_vm8, %v605_v15  ;;  %v1191_v15 = vsel %vm4625_vm1, 0, %v1190_v13  ;;  %vm1308_vm8 = vsmask.f32 4354 }
  0xbf   : > { %3914 = vmatpush3.bf16.msra.mxu0 %v4152_v50  ;;  %1192 = vst [vmem:[#allocation3 + $0x38] sm:$0x1] %v1191_v15  ;;  %v1316_v4 = vld [vmem:[#allocation3 + $0x18] sm:$0x1f] }
  0xc0   : > { %v806_v16 = vpop.permute.xlu0 %805  ;;  %v762_v17 = vpop.permute.xlu1 %761  ;;  %3915 = vmatprep.subr.bf16.mxu0 %v4155_v54 }
  0xc1   : > { %816 = vst.msk [vmem:[#allocation2 + $0x10] sm:$0xff] %vm813_vm10, %v806_v16  ;;  %v1218_v16 = vsel %vm4634_vm6, 0, %v1217_v14  ;;  %v1310_v14 = vld [vmem:[#allocation3 + $0x8] sm:$0x1f]  ;;  %v1313_v25 = vld [vmem:[#allocation3 + $0x10] sm:$0x1f] }
  0xc2   : > { %771 = vst.msk [vmem:[#allocation2 + $0x18] sm:$0xff] %vm767_vm9, %v762_v17  ;;  %v1184_v17 = vld [vmem:[#allocation3 + $0x28] sm:$0x1]  ;;  %1219 = vst [vmem:[#allocation3 + $0x38] sm:$0x10] %v1218_v16 }
  0xc3   : > { %3916 = vmatpush3.bf16.msra.mxu0 %v4156_v55  ;;  %v1422_v55 = vshll.u32 %v3596_v40, 16  ;;  %vm4785_vm9 = vmand %vm1307_vm7, %vm1308_vm8  ;;  %v1603_v40 = vrot.slane %v3617_v27, 5 }
  0xc4   : > { %v852_v18 = vpop.permute.xlu0 %851  ;;  %v808_v19 = vpop.permute.xlu1 %807  ;;  %3917 = vmatprep.subr.bf16.mxu0 %v4159_v58 }
  0xc5   : > { %862 = vst.msk [vmem:[#allocation2 + $0x10] sm:$0xff] %vm859_vm11, %v852_v18  ;;  %v1211_v18 = vld [vmem:[#allocation3 + $0x28] sm:$0x10] }
  0xc6   : > { %817 = vst.msk [vmem:[#allocation2 + $0x18] sm:$0xff] %vm813_vm10, %v808_v19  ;;  %v1185_v19 = vsel %vm4625_vm1, 0, %v1184_v17  ;;  %v2155_v17 = vrot.slane %v2153_v61, 4  ;;  %vm1598_vm10 = vcmask 1042432  }
  0xc7   : > { %3918 = vmatpush3.bf16.msra.mxu0 %v4160_v59  ;;  %1186 = vst [vmem:[#allocation3 + $0x28] sm:$0x1] %v1185_v19  ;;  %v1319_v19 = vld [vmem:[#allocation3 + $0x20] sm:$0x1f] }
  0xc8   : > { %v1009_v20 = vpop.permute.xlu0 %1008  ;;  %v854_v21 = vpop.permute.xlu1 %853  ;;  %3919 = vmatprep.subr.bf16.mxu0 %v4163_v63 }
  0xc9   : > { %1019 = vst.msk [vmem:[#allocation2 + $0x10] sm:$0xff] %vm1016_vm12, %v1009_v20  ;;  %v1212_v20 = vsel %vm4634_vm6, 0, %v1211_v18 }
  0xca   : > { %863 = vst.msk [vmem:[#allocation2 + $0x18] sm:$0xff] %vm859_vm11, %v854_v21  ;;  %v1193_v21 = vld [vmem:[#allocation3 + $0x40] sm:$0x1]  ;;  %1213 = vst [vmem:[#allocation3 + $0x28] sm:$0x10] %v1212_v20  ;;  %vm1599_vm11 = vcmask 1046532  }
  0xcb   : > { %3920 = vmatpush3.bf16.msra.mxu0 %v4164_v0  ;;  %v1421_v0 = vrot.slane %v1419_v52, 4 }
  0xcc   : > { %v1011_v22 = vpop.permute.xlu1 %1010  ;;  %3921 = vmatprep.subr.bf16.mxu0 %v4167_v2 }
  0xcd   : > { %1020 = vst.msk [vmem:[#allocation2 + $0x18] sm:$0xff] %vm1016_vm12, %v1011_v22  ;;  %v1220_v22 = vld [vmem:[#allocation3 + $0x40] sm:$0x10]  ;;  %vm4801_vm12 = vmor %vm1598_vm10, %vm1599_vm11 }
  0xcf   : > { %3922 = vmatpush3.bf16.msra.mxu0 %v4168_v5 }
  0xd0   : > { %v3251_v23 = vld [vmem:[#allocation2 + $0x10] sm:$0xff]  ;;  %3923 = vmatprep.subr.bf16.mxu0 %v4171_v6  ;;  %v1424_v6 = vrot.slane %v1422_v55, 5 }
  0xd1   : > { %3262 = vrot.lane.b32.xlu1 %v3251_v23, %s4342_s21  ;;  %4056 = vmatprep.mubr.msk.bf16.mxu0 %vm1045_vm13, %v3251_v23  ;;  %v1194_v23 = vsel %vm4625_vm1, 0, %v1193_v21 }
  0xd2   : > { %1195 = vst [vmem:[#allocation3 + $0x40] sm:$0x1] %v1194_v23  ;;  %v1425_v32 = vor.u32 %v1424_v6, %v1421_v0 }
  0xd3   : > { %3924 = vmatpush3.bf16.msra.mxu0 %v4172_v8 }
  0xd4   : > { %v1024_v24 = vld [vmem:[#allocation2 + $0x18] sm:$0xff]  ;;  %3989 = vmatprep.subr.bf16.mxu0 %v4197_v30  ;;  %v1426_v41 = vrot.slane %v1425_v32, 4 }
  0xd5   : > { %4057 = vmatmul.mubr.msk.bf16.gmra.mrb[4].mxu0 %vm1045_vm13, %v1024_v24  ;;  %3264 = vrot.lane.b32.xlu1 %v1024_v24, %s4342_s21  ;;  %v1221_v24 = vsel %vm4634_vm6, 0, %v1220_v22  ;;  %v2158_v22 = vrot.slane %v2156_v1, 5 }
  0xd6   : > { %1222 = vst [vmem:[#allocation3 + $0x40] sm:$0x10] %v1221_v24 }
 0x189   : > { %v4054_v34 = vpop.f32.mrb[0].mxu0 }
 0x18a   : > { %v1134_v36 = vmul.f32 %v4054_v34, %v4758_v31  ;;  %v1096_v37 = vpop.f32.mrb[1].mxu0 }
 0x18b   : > { %v1132_v38 = vmul.f32 %v4758_v31, %v1096_v37  ;;  %v4055_v39 = vpop.f32.mrb[2].mxu0  ;;  %v2159_v37 = vor.u32 %v2158_v22, %v2155_v17 }
 0x18c   : > { %v1147_v42 = vadd.f32 %v4765_v35, %v1134_v36  ;;  %v1135_v43 = vmul.f32 %v4055_v39, %v4758_v31  ;;  %v1099_v44 = vpop.f32.mrb[3].mxu0  ;;  %v3632_v39 = vrot.slane %v3616_v26, 9 }
 0x18d   : > { %v1145_v45 = vadd.f32 %v4765_v35, %v1132_v38  ;;  %v1133_v46 = vmul.f32 %v4758_v31, %v1099_v44  ;;  %v4799_v38 = vshll.u32 %v3715_v12, 16  ;;  %v4805_v44 = vrot.slane %v2159_v37, 4  ;;  %v4200_v37 = vld [vmem:[%s5247_s2 + $0x188] sm:$0xff]  }
 0x18e   : > { %v1155_v47 = vmax.f32 %v1147_v42, 0.0  ;;  %v1148_v48 = vadd.f32 %v4765_v35, %v1135_v43  ;;  %v1430_v42 = vrot.slane %v1428_v33, 5 }
 0x18f   : > { %v1153_v50 = vmax.f32 %v1145_v45, 0.0  ;;  %v1146_v51 = vadd.f32 %v4765_v35, %v1133_v46  ;;  %v4811_v46 = vld [vmem:[%s5248_s3] sm:$0x3] }
 0x190   : > { %v3833_v53 = vpack.c.bf16 %v1155_v47, %v1155_v47  ;;  %v1156_v54 = vmax.f32 %v1148_v48, 0.0  ;;  %v4819_v52 = vsel %vm4421_vm2, %v1426_v41, %v1430_v42 }
 0x191   : > { %v3831_v56 = vpack.c.bf16 %v1153_v50, %v1153_v50  ;;  %v1154_v57 = vmax.f32 %v1146_v51, 0.0  ;;  %v1604_v50 = vsel %vm4801_vm12, %v3632_v39, %v1603_v40 }
 0x192   : > { %v1258_v58 = vshrl.u32 %v3833_v53, 16  ;;  %v3834_v59 = vpack.c.bf16 %v1156_v54, %v1156_v54  ;;  %v1261_v3 = vshll.u32 %v3833_v53, 16 }
 0x193   : > { %v1244_v62 = vshrl.u32 %v3831_v56, 16  ;;  %v3832_v63 = vpack.c.bf16 %v1154_v57, %v1154_v57  ;;  %v1247_v9 = vshll.u32 %v3831_v56, 16 }
 0x194   : > { %v1260_v2 = vrot.slane %v1258_v58, 7  ;;  %v1265_v5 = vshrl.u32 %v3834_v59, 16  ;;  %v1268_v16 = vshll.u32 %v3834_v59, 16 }
 0x195   : > { %v1246_v8 = vrot.slane %v1244_v62, 7  ;;  %v1251_v10 = vshrl.u32 %v3832_v63, 16  ;;  %v1254_v21 = vshll.u32 %v3832_v63, 16  ;;  %v4827_v62 = vsel %vm1058_vm4, %v4811_v46, 0 }
 0x196   : > { %v1263_v13 = vor.u32 %v1261_v3, %v1260_v2  ;;  %v1267_v15 = vrot.slane %v1265_v5, 7 }
 0x197   : > { %v1249_v18 = vor.u32 %v1247_v9, %v1246_v8  ;;  %v1253_v20 = vrot.slane %v1251_v10, 7 }
 0x198   : > { %v1317_v23 = vsel %vm4785_vm9, %v1263_v13, %v1316_v4  ;;  %v1270_v24 = vor.u32 %v1268_v16, %v1267_v15 }
 0x199   : > { %1318 = vst [vmem:[#allocation3 + $0x18] sm:$0x1f] %v1317_v23  ;;  %v1311_v28 = vsel %vm4785_vm9, %v1249_v18, %v1310_v14  ;;  %v1256_v30 = vor.u32 %v1254_v21, %v1253_v20  ;;  %v4198_v14 = vld [vmem:[%s5247_s2 + $0x180] sm:$0xff]  }
 0x19a   : > { %1312 = vst [vmem:[#allocation3 + $0x8] sm:$0x1f] %v1311_v28  ;;  %v1320_v34 = vsel %vm4785_vm9, %v1270_v24, %v1319_v19  ;;  %v4199_v19 = vld [vmem:[%s5247_s2 + $0x1c8] sm:$0xff]  }
 0x19b   : > { %1321 = vst [vmem:[#allocation3 + $0x20] sm:$0x1f] %v1320_v34  ;;  %v1314_v36 = vsel %vm4785_vm9, %v1256_v30, %v1313_v25 }
 0x19c   : > { %1315 = vst [vmem:[#allocation3 + $0x10] sm:$0x1f] %v1314_v36 }
 0x1a0   : > { %v1373_v47 = vld [vmem:[#allocation3 + $0x18] sm:$0x1f] }
 0x1a1   : > { %v4813_v48 = vld [vmem:[#allocation3 + $0x18] sm:$0x1e]  ;;  %v1551_v49 = vld [vmem:[#allocation3 + $0x8] sm:$0x1e]  ;;  %v3602_v53 = vcombine.low %v1373_v47, %v1373_v47  ;;  %v3603_v59 = vcombine.high %v1373_v47, %v1373_v47 }
 0x1a2   : > { %v1371_v51 = vld [vmem:[#allocation3 + $0x8] sm:$0x1f]  ;;  %v3618_v54 = vcombine.low %v1551_v49, %v1551_v49  ;;  %v3619_v55 = vcombine.high %v1551_v49, %v1551_v49  ;;  %v3622_v60 = vcombine.low %v4813_v48, %v4813_v48  ;;  %v3623_v61 = vcombine.high %v4813_v48, %v4813_v48  ;;  %v4180_v20 = vld [vmem:[#allocation3 + $0x18] ss:$8 sps:$4 sm:$0xff]   ;;  %v4203_v49 = vld [vmem:[%s5247_s2 + $0x1d0] sm:$0xff]  }
 0x1a3   : > { %v3598_v56 = vcombine.low %v1371_v51, %v1371_v51  ;;  %v3599_v57 = vcombine.high %v1371_v51, %v1371_v51  ;;  %v4173_v58 = vld [vmem:[#allocation3 + $0x8] ss:$8 sps:$4 sm:$0xff]   ;;  %v1461_v8 = vshrl.u32 %v3602_v53, 16  ;;  %v1464_v13 = vshll.u32 %v3602_v53, 16  ;;  %v4209_v48 = vld [vmem:[%s5247_s2 + $0x198] sm:$0xff]  }
 0x1a4   : > { %v3633_v63 = vrot.slane %v3618_v54, 9  ;;  %v1607_v0 = vrot.slane %v3619_v55, 5  ;;  %v1372_v3 = vld [vmem:[#allocation3 + $0x10] sm:$0x1f]  ;;  %2995 = vmatprep.mubr.bf16.mxu0 %v4173_v58  ;;  %v1470_v27 = vshll.u32 %v3603_v59, 16 }
 0x1a5   : > { %v1433_v1 = vshrl.u32 %v3598_v56, 16  ;;  %v1436_v2 = vshll.u32 %v3598_v56, 16  ;;  %v1442_v4 = vshll.u32 %v3599_v57, 16  ;;  %v3600_v5 = vcombine.low %v1372_v3, %v1372_v3  ;;  %v1552_v9 = vld [vmem:[#allocation3 + $0x10] sm:$0x1e] }
 0x1a6   : > { %v3601_v6 = vcombine.high %v1372_v3, %v1372_v3  ;;  %v1608_v10 = vsel %vm4801_vm12, %v3633_v63, %v1607_v0  ;;  %v1463_v23 = vrot.slane %v1461_v8, 4  ;;  %v1466_v24 = vrot.slane %v1464_v13, 5  ;;  %v4187_v63 = vld [vmem:[#allocation3] ss:$8 sps:$4 sm:$0xff]   ;;  %v4944_v7 = vld [vmem:[#allocation3 + $0x10] sm:$0x1e] }
 0x1a7   : > { %v1435_v11 = vrot.slane %v1433_v1, 4  ;;  %v1438_v12 = vrot.slane %v1436_v2, 5  ;;  %v3640_v15 = vcombine.low %v1604_v50, %v1608_v10  ;;  %v1444_v16 = vrot.slane %v1442_v4, 5  ;;  %v4202_v1 = vld [vmem:[%s5247_s2 + $0x100] sm:$0xff]   ;;  %v4204_v2 = vld [vmem:[%s5247_s2 + $0x190] sm:$0xff]  }
 0x1a8   : > { %v1447_v17 = vshrl.u32 %v3600_v5, 16  ;;  %v1450_v18 = vshll.u32 %v3600_v5, 16  ;;  %v1456_v22 = vshll.u32 %v3601_v6, 16  ;;  %v3620_v28 = vcombine.low %v1552_v9, %v1552_v9  ;;  %v4058_v30 = vpop.f32.mrb[4].mxu0  ;;  %v1554_v6 = vld [vmem:[#allocation3 + $0x20] sm:$0x1e] }
 0x1a9   : > { %v1439_v21 = vor.u32 %v1438_v12, %v1435_v11  ;;  %2996 = vmatmul.mubr.bf16.vlgmr.msra.gmra.mrb[8].mxu0 %v3640_v15  ;;  %v1467_v34 = vor.u32 %v1466_v24, %v1463_v23  ;;  %v3621_v36 = vcombine.high %v1552_v9, %v1552_v9  ;;  %v1138_v39 = vmul.f32 %v4058_v30, %v4758_v31  ;;  %v1112_v40 = vpop.f32.mrb[5].mxu0  ;;  %v4207_v12 = vld [vmem:[%s5247_s2 + $0x1d8] sm:$0xff]   ;;  %v1374_v13 = vld [vmem:[#allocation3 + $0x20] sm:$0x1f] }
 0x1aa   : > { %v1449_v25 = vrot.slane %v1447_v17, 4  ;;  %v1452_v26 = vrot.slane %v1450_v18, 5  ;;  %3003 = vmatprep.mubr.bf16.mxu0 %v4180_v20  ;;  %v1458_v33 = vrot.slane %v1456_v22, 5  ;;  %3990 = vmatpush3.bf16.msra.mxu0 %v4198_v14  ;;  %v1472_v42 = vrot.slane %v1470_v27, 5  ;;  %v4059_v51 = vpop.f32.mrb[6].mxu0  ;;  %v4216_v30 = vld [vmem:[%s5247_s2 + $0x1e0] sm:$0xff]  }
 0x1ab   : > { %v1440_v32 = vrot.slane %v1439_v21, 4  ;;  %v3634_v47 = vrot.slane %v3620_v28, 9  ;;  %3991 = vmatprep.subr.bf16.mxu0 %v4199_v19  ;;  %v1136_v50 = vmul.f32 %v4758_v31, %v1112_v40  ;;  %v1468_v54 = vrot.slane %v1467_v34, 4  ;;  %v1115_v58 = vpop.f32.mrb[7].mxu0  ;;  %v4206_v19 = vld [vmem:[%s5247_s2 + $0x108] sm:$0xff]   ;;  %v4218_v40 = vld [vmem:[%s5247_s2 + $0x1a0] sm:$0xff]  }
 0x1ac   : > { %v1453_v41 = vor.u32 %v1452_v26, %v1449_v25  ;;  %v1611_v55 = vrot.slane %v3621_v36, 5  ;;  %v1151_v56 = vadd.f32 %v4765_v35, %v1138_v39  ;;  %v1139_v57 = vmul.f32 %v4059_v51, %v4758_v31 }
 0x1ad   : > { %v1445_v53 = vsel %vm4421_vm2, %v1440_v32, %v1444_v16  ;;  %v1149_v3 = vadd.f32 %v4765_v35, %v1136_v50  ;;  %v1137_v4 = vmul.f32 %v4758_v31, %v1115_v58  ;;  %v1473_v5 = vsel %vm4421_vm2, %v1468_v54, %v1472_v42  ;;  %v4205_v31 = vld [vmem:[%s5247_s2 + $0x148] sm:$0xff]   ;;  %v1328_v32 = vld [vmem:[#allocation3 + $0x38] sm:$0x1f]  ;;  %v2006_v58 = vld [vmem:[#allocation3 + $0x10] sm:$0x1f] }
 0x1ae   : > { %v3612_v59 = vcombine.low %v4819_v52, %v1445_v53  ;;  %v1454_v0 = vrot.slane %v1453_v41, 4  ;;  %v1612_v52 = vsel %vm4801_vm12, %v3634_v47, %v1611_v55  ;;  %3992 = vmatpush3.bf16.msra.mxu0 %v4200_v37  ;;  %v1159_v8 = vmax.f32 %v1151_v56, 0.0  ;;  %v4211_v37 = vld [vmem:[%s5247_s2 + $0x110] sm:$0xff]   ;;  %v1322_v42 = vld [vmem:[#allocation3 + $0x28] sm:$0x1f]  ;;  %v4219_v56 = vld [vmem:[%s5247_s2 + $0x158] sm:$0xff]  }
 0x1af   : > { %v1152_v9 = vadd.f32 %v4765_v35, %v1139_v57  ;;  %v3635_v11 = vrot.slane %v3622_v60, 9  ;;  %3993 = vmatprep.subr.bf16.mxu0 %v4203_v49  ;;  %v1157_v14 = vmax.f32 %v1149_v3, 0.0  ;;  %v1150_v15 = vadd.f32 %v4765_v35, %v1137_v4  ;;  %v4196_v50 = vld [vmem:[#allocation3 + $0x10] ss:$8 sps:$4 sm:$0xff]  }
 0x1b0   : > { %2930 = vmatprep.mubr.bf16.mxu1 %v3612_v59  ;;  %v1459_v10 = vsel %vm4421_vm2, %v1454_v0, %v1458_v33  ;;  %v1615_v17 = vrot.slane %v3623_v61, 5  ;;  %v3837_v60 = vpack.c.bf16 %v1159_v8, %v1159_v8  ;;  %v3624_v20 = vcombine.low %v1554_v6, %v1554_v6  ;;  %v4210_v61 = vld [vmem:[%s5247_s2 + $0x150] sm:$0xff]   ;;  %v1331_v0 = vld [vmem:[#allocation3 + $0x40] sm:$0x1f]  ;;  %v2007_v8 = vld [vmem:[#allocation3 + $0x18] sm:$0x1f] }
 0x1b1   : > { %2931 = vmatmul.mubr.bf16.vlgmr.msra.gmra.mrb[0].mxu1 %v4187_v63  ;;  %v3613_v16 = vcombine.low %v1459_v10, %v1473_v5  ;;  %v1160_v18 = vmax.f32 %v1152_v9, 0.0  ;;  %v3625_v21 = vcombine.high %v1554_v6, %v1554_v6  ;;  %v3835_v22 = vpack.c.bf16 %v1157_v14, %v1157_v14 }
 0x1b2   : > { %3950 = vmatpush3.bf16.msra.mxu1 %v4202_v1  ;;  %v1158_v23 = vmax.f32 %v1150_v15, 0.0  ;;  %v1616_v35 = vsel %vm4801_vm12, %v3635_v11, %v1615_v17  ;;  %3994 = vmatpush3.bf16.msra.mxu0 %v4204_v2  ;;  %v3604_v24 = vcombine.low %v1374_v13, %v1374_v13  ;;  %v1286_v25 = vshrl.u32 %v3837_v60, 16  ;;  %v4221_v2 = vld [vmem:[%s5247_s2 + $0x1e8] sm:$0xff]   ;;  %v1325_v11 = vld [vmem:[#allocation3 + $0x30] sm:$0x1f] }
 0x1b3   : > { %2938 = vmatprep.mubr.bf16.mxu1 %v3613_v16  ;;  %v1289_v26 = vshll.u32 %v3837_v60, 16  ;;  %v3838_v27 = vpack.c.bf16 %v1160_v18, %v1160_v18  ;;  %v3641_v28 = vcombine.low %v1612_v52, %v1616_v35  ;;  %3951 = vmatprep.subr.bf16.mxu1 %v4205_v31  ;;  %v1272_v33 = vshrl.u32 %v3835_v22, 16  ;;  %v4220_v31 = vld [vmem:[%s5247_s2 + $0x118] sm:$0xff]   ;;  %v4222_v16 = vld [vmem:[%s5247_s2 + $0x1a8] sm:$0xff]   ;;  %v4227_v18 = vld [vmem:[%s5247_s2 + $0x160] sm:$0xff]  }
 0x1b4   : > { %3995 = vmatprep.subr.bf16.mxu0 %v4207_v12  ;;  %v1275_v34 = vshll.u32 %v3835_v22, 16  ;;  %v3836_v36 = vpack.c.bf16 %v1158_v23, %v1158_v23  ;;  %v4895_v39 = vrot.slane %v3624_v20, 9  ;;  %v1288_v41 = vrot.slane %v1286_v25, 7  ;;  %v4238_v20 = vld [vmem:[%s5247_s2 + $0x1f0] sm:$0xff]   ;;  %v4930_v35 = vld [vmem:[#allocation3 + $0x8] sm:$0x1e] }
 0x1b5   : > { %v1293_v47 = vshrl.u32 %v3838_v27, 16  ;;  %v1296_v49 = vshll.u32 %v3838_v27, 16  ;;  %3004 = vmatmul.mubr.bf16.gmra.mrb[12].mxu0 %v3641_v28  ;;  %v4900_v51 = vrot.slane %v3625_v21, 5  ;;  %v1274_v53 = vrot.slane %v1272_v33, 7  ;;  %v4239_v25 = vld [vmem:[%s5247_s2 + $0x1b0] sm:$0xff]  }
 0x1b6   : > { %3952 = vmatpush3.bf16.msra.mxu1 %v4206_v19  ;;  %v1279_v54 = vshrl.u32 %v3836_v36, 16  ;;  %v1282_v55 = vshll.u32 %v3836_v36, 16  ;;  %3996 = vmatpush3.bf16.msra.mxu0 %v4209_v48  ;;  %v3605_v57 = vcombine.high %v1374_v13, %v1374_v13  ;;  %v1291_v59 = vor.u32 %v1289_v26, %v1288_v41 }
 0x1b7   : > { %3953 = vmatprep.subr.bf16.mxu1 %v4210_v61  ;;  %v1295_v63 = vrot.slane %v1293_v47, 7  ;;  %v1620_v1 = vsel %vm4801_vm12, %v4895_v39, %v4900_v51  ;;  %3997 = vmatprep.subr.bf16.mxu0 %v4216_v30  ;;  %v1475_v3 = vshrl.u32 %v3604_v24, 16  ;;  %v1277_v4 = vor.u32 %v1275_v34, %v1274_v53  ;;  %v5038_v39 = vld [vmem:[%s5247_s2 + $0x200] sm:$0xff]  }
 0x1b8   : > { %v1281_v5 = vrot.slane %v1279_v54, 7  ;;  %v1478_v52 = vshll.u32 %v3604_v24, 16  ;;  %v1484_v6 = vshll.u32 %v3605_v57, 16  ;;  %v1329_v9 = vsel %vm4785_vm9, %v1291_v59, %v1328_v32  ;;  %v4229_v24 = vld [vmem:[%s5247_s2 + $0x120] sm:$0xff]   ;;  %v4245_v54 = vld [vmem:[%s5247_s2 + $0x128] sm:$0xff]  }
 0x1b9   : > { %2939 = vmatmul.mubr.bf16.gmra.mrb[4].mxu1 %v4196_v50  ;;  %v1298_v10 = vor.u32 %v1296_v49, %v1295_v63  ;;  %v1477_v12 = vrot.slane %v1475_v3, 4  ;;  %v3700_v13 = vcombine.low %v2006_v58, %v2006_v58  ;;  %1330 = vst [vmem:[#allocation3 + $0x38] sm:$0x1f] %v1329_v9  ;;  %v1323_v14 = vsel %vm4785_vm9, %v1277_v4, %v1322_v42  ;;  %v4955_v42 = vld [vmem:[#allocation3 + $0x20] sm:$0x1f] }
 0x1ba   : > { %3954 = vmatpush3.bf16.msra.mxu1 %v4211_v37  ;;  %v1284_v15 = vor.u32 %v1282_v55, %v1281_v5  ;;  %3998 = vmatpush3.bf16.msra.mxu0 %v4218_v40  ;;  %v1480_v17 = vrot.slane %v1478_v52, 5  ;;  %v1486_v60 = vrot.slane %v1484_v6, 5  ;;  %1324 = vst [vmem:[#allocation3 + $0x28] sm:$0x1f] %v1323_v14  ;;  %v3701_v21 = vcombine.high %v2006_v58, %v2006_v58  ;;  %v4244_v40 = vld [vmem:[%s5247_s2 + $0x168] sm:$0xff]   ;;  %v4246_v55 = vld [vmem:[%s5247_s2 + $0x1f8] sm:$0xff]  }
 0x1bb   : > { %3955 = vmatprep.subr.bf16.mxu1 %v4219_v56  ;;  %v1332_v19 = vsel %vm4785_vm9, %v1298_v10, %v1331_v0  ;;  %3999 = vmatprep.subr.bf16.mxu0 %v4221_v2  ;;  %v3702_v22 = vcombine.low %v2007_v8, %v2007_v8  ;;  %v3703_v23 = vcombine.high %v2007_v8, %v2007_v8  ;;  %v2055_v26 = vshrl.u32 %v3700_v13, 16  ;;  %v4247_v58 = vld [vmem:[%s5247_s2 + $0x1b8] sm:$0xff]   ;;  %v4982_v0 = vld [vmem:[#allocation3 + $0x8] sm:$0x1f]  ;;  %v4984_v2 = vld [vmem:[#allocation3 + $0x10] sm:$0x1f] }
 0x1bc   : > { %1333 = vst [vmem:[#allocation3 + $0x40] sm:$0x1f] %v1332_v19  ;;  %v1326_v48 = vsel %vm4785_vm9, %v1284_v15, %v1325_v11  ;;  %v1481_v61 = vor.u32 %v1480_v17, %v1477_v12  ;;  %v2058_v27 = vshll.u32 %v3700_v13, 16  ;;  %v4940_v28 = vshll.u32 %v3701_v21, 16  ;;  %v4248_v52 = vld [vmem:[%s5247_s2 + $0x170] sm:$0xff]  }
 0x1bd   : > { %1327 = vst [vmem:[#allocation3 + $0x30] sm:$0x1f] %v1326_v48  ;;  %v2069_v30 = vshrl.u32 %v3702_v22, 16  ;;  %v2072_v32 = vshll.u32 %v3702_v22, 16  ;;  %v4942_v33 = vshll.u32 %v3703_v23, 16  ;;  %v4946_v36 = vrot.slane %v2055_v26, 4 }
 0x1be   : > { %3956 = vmatpush3.bf16.msra.mxu1 %v4220_v31  ;;  %4000 = vmatpush3.bf16.msra.mxu0 %v4222_v16  ;;  %v1482_v34 = vrot.slane %v1481_v61, 4  ;;  %v4948_v37 = vrot.slane %v2058_v27, 5  ;;  %v3668_v41 = vcombine.low %v4930_v35, %v4930_v35  ;;  %v2066_v47 = vrot.slane %v4940_v28, 5 }
 0x1bf   : > { %3957 = vmatprep.subr.bf16.mxu1 %v4227_v18  ;;  %4001 = vmatprep.subr.bf16.mxu0 %v4238_v20  ;;  %v4958_v49 = vrot.slane %v2069_v30, 4  ;;  %v4960_v50 = vrot.slane %v2072_v32, 5  ;;  %v2080_v53 = vrot.slane %v4942_v33, 5  ;;  %v3669_v59 = vcombine.high %v4930_v35, %v4930_v35  ;;  %v4250_v18 = vld [vmem:[%s5247_s2 + $0x130] sm:$0xff]   ;;  %v4260_v20 = vld [vmem:[%s5247_s2 + $0x178] sm:$0xff]  }
 0x1c0   : > { %v4971_v56 = vsel %vm4421_vm2, %v1482_v34, %v1486_v60  ;;  %v2061_v57 = vor.u32 %v4948_v37, %v4946_v36  ;;  %v3670_v63 = vcombine.low %v4944_v7, %v4944_v7  ;;  %v1377_v3 = vld [vmem:[#allocation3 + $0x38] sm:$0x1f]  ;;  %v3671_v6 = vcombine.high %v4944_v7, %v4944_v7 }
 0x1c1   : > { %v4986_v4 = vld [vmem:[#allocation3 + $0x38] sm:$0x1e]  ;;  %v2075_v5 = vor.u32 %v4960_v50, %v4958_v49  ;;  %v4997_v8 = vcombine.low %v4955_v42, %v4955_v42  ;;  %v3705_v9 = vcombine.high %v4955_v42, %v4955_v42  ;;  %v1555_v10 = vld [vmem:[#allocation3 + $0x28] sm:$0x1e]  ;;  %v3610_v31 = vcombine.low %v1377_v3, %v1377_v3 }
 0x1c2   : > { %3958 = vmatpush3.bf16.msra.mxu1 %v4229_v24  ;;  %v1375_v11 = vld [vmem:[#allocation3 + $0x28] sm:$0x1f]  ;;  %v3611_v12 = vcombine.high %v1377_v3, %v1377_v3  ;;  %v3630_v13 = vcombine.low %v4986_v4, %v4986_v4  ;;  %v3631_v14 = vcombine.high %v4986_v4, %v4986_v4  ;;  %4002 = vmatpush3.bf16.msra.mxu0 %v4239_v25  ;;  %v3684_v36 = vrot.slane %v3668_v41, 9  ;;  %v1871_v42 = vld [vmem:[#allocation3 + $0x18] sm:$0x1e] }
 0x1c3   : > { %v3626_v15 = vcombine.low %v1555_v10, %v1555_v10  ;;  %v3627_v16 = vcombine.high %v1555_v10, %v1555_v10  ;;  %v3606_v17 = vcombine.low %v1375_v11, %v1375_v11  ;;  %v3607_v60 = vcombine.high %v1375_v11, %v1375_v11  ;;  %3959 = vmatprep.subr.bf16.mxu1 %v4244_v40 }
 0x1c4   : > { %v4208_v19 = vld [vmem:[#allocation3 + $0x28] ss:$8 sps:$4 sm:$0xff]   ;;  %4003 = vmatprep.subr.bf16.mxu0 %v4246_v55  ;;  %v5013_v21 = vcombine.low %v4982_v0, %v4982_v0  ;;  %v3649_v22 = vcombine.high %v4982_v0, %v4982_v0  ;;  %v5019_v23 = vcombine.low %v4984_v2, %v4984_v2  ;;  %v3651_v48 = vcombine.high %v4984_v2, %v4984_v2 }
 0x1c5   : > { %v3637_v61 = vrot.slane %v3626_v15, 9  ;;  %v1623_v24 = vrot.slane %v3627_v16, 5  ;;  %v1489_v25 = vshrl.u32 %v3606_v17, 16  ;;  %v1492_v26 = vshll.u32 %v3606_v17, 16  ;;  %v1376_v27 = vld [vmem:[#allocation3 + $0x30] sm:$0x1f]  ;;  %3011 = vmatprep.mubr.bf16.mxu0 %v4208_v19 }
 0x1c6   : > { %3960 = vmatpush3.bf16.msra.mxu1 %v4245_v54  ;;  %v1498_v30 = vshll.u32 %v3607_v60, 16  ;;  %v3608_v32 = vcombine.low %v1376_v27, %v1376_v27  ;;  %v3609_v34 = vcombine.high %v1376_v27, %v1376_v27  ;;  %v1517_v40 = vshrl.u32 %v3610_v31, 16  ;;  %v1556_v55 = vld [vmem:[#allocation3 + $0x30] sm:$0x1e]  ;;  %4004 = vmatpush3.bf16.msra.mxu0 %v4247_v58  ;;  %v4217_v58 = vld [vmem:[#allocation3 + $0x38] ss:$8 sps:$4 sm:$0xff]  }
 0x1c7   : > { %v1624_v3 = vsel %vm4801_vm12, %v3637_v61, %v1623_v24  ;;  %v1491_v10 = vrot.slane %v1489_v25, 4  ;;  %v1494_v11 = vrot.slane %v1492_v26, 5  ;;  %v1520_v45 = vshll.u32 %v3610_v31, 16  ;;  %3961 = vmatprep.subr.bf16.mxu1 %v4248_v52  ;;  %4097 = vmatprep.subr.msk.bf16.mxu0 %vm1058_vm4, %v4811_v46  ;;  %v4261_v52 = vld [vmem:[%s5247_s2 + $0x138] sm:$0xff]   ;;  %v2010_v2 = vld [vmem:[#allocation3 + $0x30] sm:$0x1f] }
 0x1c8   : > { %v3642_v54 = vcombine.low %v1620_v1, %v1624_v3  ;;  %v1500_v15 = vrot.slane %v1498_v30, 5  ;;  %v1503_v16 = vshrl.u32 %v3608_v32, 16  ;;  %v1506_v17 = vshll.u32 %v3608_v32, 16 }
 0x1c9   : > { %v1495_v60 = vor.u32 %v1494_v11, %v1491_v10  ;;  %v1512_v19 = vshll.u32 %v3609_v34, 16  ;;  %v1519_v61 = vrot.slane %v1517_v40, 4  ;;  %v1522_v24 = vrot.slane %v1520_v45, 5 }
 0x1ca   : > { %3962 = vmatpush3.bf16.msra.mxu1 %v4250_v18  ;;  %3012 = vmatmul.mubr.bf16.gmra.mrb[16].mxu0 %v3642_v54  ;;  %v1505_v46 = vrot.slane %v1503_v16, 4  ;;  %v1508_v31 = vrot.slane %v1506_v17, 5  ;;  %v1526_v25 = vshll.u32 %v3611_v12, 16  ;;  %v3628_v26 = vcombine.low %v1556_v55, %v1556_v55  ;;  %v4228_v12 = vld [vmem:[#allocation3 + $0x20] ss:$8 sps:$4 sm:$0xff]  }
 0x1cb   : > { %3963 = vmatprep.subr.bf16.mxu1 %v4260_v20  ;;  %3019 = vmatprep.mubr.bf16.mxu0 %v4217_v58  ;;  %v1496_v51 = vrot.slane %v1495_v60, 4  ;;  %v1514_v1 = vrot.slane %v1512_v19, 5  ;;  %v1523_v45 = vor.u32 %v1522_v24, %v1519_v61  ;;  %v3629_v18 = vcombine.high %v1556_v55, %v1556_v55 }
 0x1cc   : > { %v1509_v27 = vor.u32 %v1508_v31, %v1505_v46  ;;  %v1528_v30 = vrot.slane %v1526_v25, 5  ;;  %v3638_v32 = vrot.slane %v3628_v26, 9  ;;  %v3639_v34 = vrot.slane %v3630_v13, 9  ;;  %v4255_v31 = vld [vmem:[#allocation3 + $0x10] ss:$8 sps:$4 sm:$0xff]  }
 0x1cd   : > { %v1501_v40 = vsel %vm4421_vm2, %v1496_v51, %v1500_v15  ;;  %v1524_v3 = vrot.slane %v1523_v45, 4  ;;  %v1627_v20 = vrot.slane %v3629_v18, 5  ;;  %v1631_v10 = vrot.slane %v3631_v14, 5  ;;  %v2009_v15 = vld [vmem:[#allocation3 + $0x28] sm:$0x1f] }
 0x1ce   : > { %3964 = vmatpush3.bf16.msra.mxu1 %v4261_v52  ;;  %v3614_v11 = vcombine.low %v4971_v56, %v1501_v40  ;;  %v1510_v54 = vrot.slane %v1509_v27, 4  ;;  %v2062_v55 = vrot.slane %v2061_v57, 4  ;;  %v2076_v13 = vrot.slane %v2075_v5, 4 }
 0x1cf   : > { %4060 = vmatprep.subr.bf16.mxu1 %v5038_v39  ;;  %v1529_v16 = vsel %vm4421_vm2, %v1524_v3, %v1528_v30  ;;  %v1628_v4 = vsel %vm4801_vm12, %v3638_v32, %v1627_v20  ;;  %v1632_v56 = vsel %vm4801_vm12, %v3639_v34, %v1631_v10  ;;  %v1919_v41 = vrot.slane %v3669_v59, 5 }
 0x1d0   : > { %2946 = vmatprep.mubr.bf16.mxu1 %v3614_v11  ;;  %v1515_v37 = vsel %vm4421_vm2, %v1510_v54, %v1514_v1  ;;  %v3643_v49 = vcombine.low %v1628_v4, %v1632_v56  ;;  %v2067_v50 = vsel %vm4421_vm2, %v2062_v55, %v2066_v47  ;;  %v2081_v57 = vsel %vm4421_vm2, %v2076_v13, %v2080_v53 }
 0x1d1   : > { %2947 = vmatmul.mubr.bf16.gmra.mrb[8].mxu1 %v4228_v12  ;;  %v3615_v5 = vcombine.low %v1515_v37, %v1529_v16  ;;  %v3716_v14 = vcombine.low %v2067_v50, %v2081_v57  ;;  %v3685_v17 = vrot.slane %v3670_v63, 9  ;;  %v1923_v28 = vrot.slane %v3671_v6, 5  ;;  %v1872_v12 = vld [vmem:[#allocation3 + $0x20] sm:$0x1e] }
 0x1d2   : > { %3020 = vmatmul.mubr.bf16.gmra.mrb[20].mxu0 %v3643_v49  ;;  %v3706_v33 = vcombine.low %v2009_v15, %v2009_v15  ;;  %v3707_v47 = vcombine.high %v2009_v15, %v2009_v15  ;;  %v2083_v53 = vshrl.u32 %v4997_v8, 16  ;;  %v1920_v58 = vsel %vm4801_vm12, %v3684_v36, %v1919_v41  ;;  %v2011_v36 = vld [vmem:[#allocation3 + $0x38] sm:$0x1f] }
 0x1d3   : > { %2954 = vmatprep.mubr.bf16.mxu1 %v3615_v5  ;;  %3125 = vmatprep.mubr.bf16.mxu0 %v3716_v14  ;;  %v2086_v35 = vshll.u32 %v4997_v8, 16  ;;  %v2092_v59 = vshll.u32 %v3705_v9, 16  ;;  %v1738_v63 = vshrl.u32 %v5013_v21, 16  ;;  %v1924_v7 = vsel %vm4801_vm12, %v3685_v17, %v1923_v28  ;;  %v4249_v9 = vld [vmem:[#allocation3 + $0x30] ss:$8 sps:$4 sm:$0xff]  }
 0x1d4   : > { %v2085_v6 = vrot.slane %v2083_v53, 4  ;;  %v2097_v60 = vshrl.u32 %v3706_v33, 16  ;;  %v2100_v19 = vshll.u32 %v3706_v33, 16  ;;  %v3692_v61 = vcombine.low %v1920_v58, %v1924_v7  ;;  %v1691_v58 = vld [vmem:[#allocation3 + $0x18] sm:$0x1f] }
 0x1d5   : > { %v2088_v24 = vrot.slane %v2086_v35, 5  ;;  %v2094_v52 = vrot.slane %v2092_v59, 5  ;;  %v2106_v46 = vshll.u32 %v3707_v47, 16  ;;  %v1740_v8 = vrot.slane %v1738_v63, 4  ;;  %v4271_v63 = vld [vmem:[#allocation3 + $0x20] ss:$8 sps:$4 sm:$0xff]  }
 0x1d6   : > { %v2099_v25 = vrot.slane %v2097_v60, 4  ;;  %v2102_v26 = vrot.slane %v2100_v19, 5  ;;  %v1741_v51 = vshll.u32 %v5013_v21, 16  ;;  %v1747_v18 = vshll.u32 %v3649_v22, 16 }
 0x1d7   : > { %v2089_v1 = vor.u32 %v2088_v24, %v2085_v6  ;;  %v2108_v45 = vrot.slane %v2106_v46, 5  ;;  %v1752_v27 = vshrl.u32 %v5019_v23, 16  ;;  %v1755_v34 = vshll.u32 %v5019_v23, 16  ;;  %v1692_v46 = vld [vmem:[#allocation3 + $0x20] sm:$0x1f] }
 0x1d8   : > { %v2103_v30 = vor.u32 %v2102_v26, %v2099_v25  ;;  %v1743_v32 = vrot.slane %v1741_v51, 5  ;;  %v1761_v40 = vshll.u32 %v3651_v48, 16  ;;  %v1749_v3 = vrot.slane %v1747_v18, 5 }
 0x1d9   : > { %2955 = vmatmul.mubr.bf16.gmra.mrb[12].mxu1 %v4249_v9  ;;  %v2090_v21 = vrot.slane %v2089_v1, 4  ;;  %v1754_v20 = vrot.slane %v1752_v27, 4  ;;  %v3672_v10 = vcombine.low %v1871_v42, %v1871_v42  ;;  %v1757_v11 = vrot.slane %v1755_v34, 5  ;;  %v4277_v34 = vld [vmem:[%s5247_s2 + $0x210] sm:$0xff]  }
 0x1da   : > { %3060 = vmatprep.mubr.bf16.mxu1 %v3692_v61  ;;  %3126 = vmatmul.mubr.bf16.vlgmr.msra.gmra.mrb[24].mxu0 %v4255_v31  ;;  %v2104_v0 = vrot.slane %v2103_v30, 4  ;;  %v1744_v22 = vor.u32 %v1743_v32, %v1740_v8  ;;  %v1763_v54 = vrot.slane %v1761_v40, 5  ;;  %v3673_v23 = vcombine.high %v1871_v42, %v1871_v42 }
 0x1db   : > { %v2095_v55 = vsel %vm4421_vm2, %v2090_v21, %v2094_v52  ;;  %v3674_v13 = vcombine.low %v1872_v12, %v1872_v12  ;;  %v3675_v15 = vcombine.high %v1872_v12, %v1872_v12  ;;  %4085 = vmatpush3.bf16.msra.mxu0 %v4827_v62  ;;  %v1758_v4 = vor.u32 %v1757_v11, %v1754_v20  ;;  %v4276_v52 = vld [vmem:[%s5247_s2 + $0x208] sm:$0xff]  }
 0x1dc   : > { %v2109_v48 = vsel %vm4421_vm2, %v2104_v0, %v2108_v45  ;;  %v1745_v16 = vrot.slane %v1744_v22, 4  ;;  %v3686_v56 = vrot.slane %v3672_v10, 9  ;;  %v1927_v49 = vrot.slane %v3673_v23, 5  ;;  %v1873_v22 = vld [vmem:[#allocation3 + $0x28] sm:$0x1e] }
 0x1dd   : > { %v3717_v37 = vcombine.low %v2095_v55, %v2109_v48  ;;  %v3687_v50 = vrot.slane %v3674_v13, 9  ;;  %v1931_v57 = vrot.slane %v3675_v15, 5  ;;  %v1759_v14 = vrot.slane %v1758_v4, 4  ;;  %v1874_v23 = vld [vmem:[#allocation3 + $0x30] sm:$0x1e] }
 0x1de   : > { %v1750_v5 = vsel %vm4421_vm2, %v1745_v16, %v1749_v3  ;;  %v3708_v41 = vcombine.low %v2010_v2, %v2010_v2  ;;  %v3709_v17 = vcombine.high %v2010_v2, %v2010_v2  ;;  %v1928_v28 = vsel %vm4801_vm12, %v3686_v56, %v1927_v49  ;;  %v2012_v16 = vld [vmem:[#allocation3 + $0x40] sm:$0x1f]  ;;  %v4291_v49 = vld [vmem:[%s5247_s2 + $0x218] sm:$0xff]  }
 0x1df   : > { %3133 = vmatprep.mubr.bf16.mxu0 %v3717_v37  ;;  %v1932_v33 = vsel %vm4801_vm12, %v3687_v50, %v1931_v57  ;;  %v3710_v47 = vcombine.low %v2011_v36, %v2011_v36  ;;  %v3711_v53 = vcombine.high %v2011_v36, %v2011_v36  ;;  %v1764_v35 = vsel %vm4421_vm2, %v1759_v14, %v1763_v54 }
 0x1e0   : > { %v3693_v59 = vcombine.low %v1928_v28, %v1932_v33  ;;  %v2111_v7 = vshrl.u32 %v3708_v41, 16  ;;  %v2114_v6 = vshll.u32 %v3708_v41, 16  ;;  %v3664_v60 = vcombine.low %v1750_v5, %v1764_v35  ;;  %v4286_v41 = vld [vmem:[#allocation3 + $0x30] ss:$8 sps:$4 sm:$0xff]  }
 0x1e1   : > { %v2120_v19 = vshll.u32 %v3709_v17, 16  ;;  %v2125_v61 = vshrl.u32 %v3710_v47, 16  ;;  %v2128_v24 = vshll.u32 %v3710_v47, 16  ;;  %v2134_v26 = vshll.u32 %v3711_v53, 16  ;;  %v1693_v53 = vld [vmem:[#allocation3 + $0x28] sm:$0x1f] }
 0x1e2   : > { %3134 = vmatmul.mubr.bf16.gmra.mrb[28].mxu0 %v4271_v63  ;;  %v2113_v31 = vrot.slane %v2111_v7, 4  ;;  %v2116_v25 = vrot.slane %v2114_v6, 5  ;;  %v3652_v8 = vcombine.low %v1691_v58, %v1691_v58  ;;  %3061 = vmatmul.mubr.bf16.vlgmr.msra.gmra.mrb[16].mxu1 %v3664_v60  ;;  %v3653_v1 = vcombine.high %v1691_v58, %v1691_v58 }
 0x1e3   : > { %v2122_v51 = vrot.slane %v2120_v19, 5  ;;  %v2127_v42 = vrot.slane %v2125_v61, 4  ;;  %v2130_v9 = vrot.slane %v2128_v24, 5  ;;  %4061 = vmatpush3.bf16.msra.mxu1 %v5038_v39  ;;  %3068 = vmatprep.mubr.bf16.mxu1 %v3693_v59  ;;  %v2136_v18 = vrot.slane %v2134_v26, 5  ;;  %v4292_v24 = vld [vmem:[%s5247_s2 + $0x220] sm:$0xff]  }
 0x1e4   : > { %v2117_v45 = vor.u32 %v2116_v25, %v2113_v31  ;;  %v3654_v27 = vcombine.low %v1692_v46, %v1692_v46  ;;  %v3655_v30 = vcombine.high %v1692_v46, %v1692_v46  ;;  %4062 = vmatprep.subr.bf16.mxu1 %v4276_v52  ;;  %v1766_v40 = vshrl.u32 %v3652_v8, 16 }
 0x1e5   : > { %v2131_v32 = vor.u32 %v2130_v9, %v2127_v42  ;;  %v1769_v12 = vshll.u32 %v3652_v8, 16  ;;  %v1775_v21 = vshll.u32 %v3653_v1, 16  ;;  %v3676_v36 = vcombine.low %v1873_v22, %v1873_v22  ;;  %v1875_v42 = vld [vmem:[#allocation3 + $0x38] sm:$0x1e] }
 0x1e6   : > { %v2118_v3 = vrot.slane %v2117_v45, 4  ;;  %v1780_v20 = vshrl.u32 %v3654_v27, 16  ;;  %v1783_v10 = vshll.u32 %v3654_v27, 16  ;;  %v1789_v0 = vshll.u32 %v3655_v30, 16 }
 0x1e7   : > { %v2132_v39 = vrot.slane %v2131_v32, 4  ;;  %v1768_v11 = vrot.slane %v1766_v40, 4  ;;  %v1771_v54 = vrot.slane %v1769_v12, 5  ;;  %v1777_v55 = vrot.slane %v1775_v21, 5  ;;  %4063 = vmatpush3.bf16.msra.mxu1 %v4276_v52  ;;  %v1694_v52 = vld [vmem:[#allocation3 + $0x30] sm:$0x1f] }
 0x1e8   : > { %v2123_v13 = vsel %vm4421_vm2, %v2118_v3, %v2122_v51  ;;  %v1782_v15 = vrot.slane %v1780_v20, 4  ;;  %v1785_v2 = vrot.slane %v1783_v10, 5  ;;  %v1791_v48 = vrot.slane %v1789_v0, 5  ;;  %4064 = vmatprep.subr.bf16.mxu1 %v4277_v34  ;;  %v4302_v40 = vld [vmem:[%s5247_s2 + $0x228] sm:$0xff]   ;;  %v1876_v20 = vld [vmem:[#allocation3 + $0x40] sm:$0x1e] }
 0x1e9   : > { %v2137_v4 = vsel %vm4421_vm2, %v2132_v39, %v2136_v18  ;;  %v1772_v56 = vor.u32 %v1771_v54, %v1768_v11  ;;  %v3677_v37 = vcombine.high %v1873_v22, %v1873_v22  ;;  %v3678_v5 = vcombine.low %v1874_v23, %v1874_v23 }
 0x1ea   : > { %v3718_v50 = vcombine.low %v2123_v13, %v2137_v4  ;;  %v1786_v57 = vor.u32 %v1785_v2, %v1782_v15  ;;  %v3679_v14 = vcombine.high %v1874_v23, %v1874_v23  ;;  %v3688_v28 = vrot.slane %v3676_v36, 9  ;;  %v1695_v15 = vld [vmem:[#allocation3 + $0x38] sm:$0x1f]  ;;  %v1696_v36 = vld [vmem:[#allocation3 + $0x40] sm:$0x1f] }
 0x1eb   : > { %v1773_v17 = vrot.slane %v1772_v56, 4  ;;  %v1935_v33 = vrot.slane %v3677_v37, 5  ;;  %v3712_v47 = vcombine.low %v2012_v16, %v2012_v16  ;;  %4065 = vmatpush3.bf16.msra.mxu1 %v4277_v34  ;;  %v3689_v35 = vrot.slane %v3678_v5, 9  ;;  %v4303_v56 = vld [vmem:[%s5247_s2 + $0x230] sm:$0xff]  }
 0x1ec   : > { %3141 = vmatprep.mubr.bf16.mxu0 %v3718_v50  ;;  %v1787_v58 = vrot.slane %v1786_v57, 4  ;;  %v1939_v59 = vrot.slane %v3679_v14, 5  ;;  %v3713_v63 = vcombine.high %v2012_v16, %v2012_v16  ;;  %v5263_v19 = vrot.slane %v4799_v38, 5  ;;  %4066 = vmatprep.subr.bf16.mxu1 %v4291_v49 }
 0x1ed   : > { %v1778_v7 = vsel %vm4421_vm2, %v1773_v17, %v1777_v55  ;;  %3142 = vmatmul.mubr.bf16.gmra.mrb[32].mxu0 %v4286_v41  ;;  %v2139_v6 = vshrl.u32 %v3712_v47, 16  ;;  %v2142_v60 = vshll.u32 %v3712_v47, 16  ;;  %v3656_v26 = vcombine.low %v1693_v53, %v1693_v53  ;;  %v4301_v17 = vld [vmem:[#allocation3 + $0x40] ss:$8 sps:$4 sm:$0xff]  }
 0x1ee   : > { %v2165_v61 = vsel %vm4421_vm2, %v4805_v44, %v5263_v19  ;;  %v1792_v46 = vsel %vm4421_vm2, %v1787_v58, %v1791_v48  ;;  %v1940_v31 = vsel %vm4801_vm12, %v3689_v35, %v1939_v59  ;;  %v2148_v25 = vshll.u32 %v3713_v63, 16  ;;  %v3259_v35 = vpop.permute.xlu0 %3258  ;;  %v4312_v19 = vld [vmem:[%s5247_s2 + $0x238] sm:$0xff]  }
 0x1ef   : > { %v3665_v8 = vcombine.low %v1778_v7, %v1792_v46  ;;  %v1936_v38 = vsel %vm4801_vm12, %v3688_v28, %v1935_v33  ;;  %v2141_v51 = vrot.slane %v2139_v6, 4  ;;  %v2144_v44 = vrot.slane %v2142_v60, 5  ;;  %4067 = vmatpush3.bf16.msra.mxu1 %v4291_v49  ;;  %v2186_v60 = vld [vmem:[#allocation3 + $0x10] sm:$0x1e] }
 0x1f0   : > { %v3694_v9 = vcombine.low %v1936_v38, %v1940_v31  ;;  %v3657_v1 = vcombine.high %v1693_v53, %v1693_v53  ;;  %v3658_v45 = vcombine.low %v1694_v52, %v1694_v52  ;;  %v3659_v18 = vcombine.high %v1694_v52, %v1694_v52  ;;  %4068 = vmatprep.subr.bf16.mxu1 %v4292_v24  ;;  %v2187_v31 = vld [vmem:[#allocation3 + $0x18] sm:$0x1e] }
 0x1f1   : > { %3069 = vmatmul.mubr.bf16.gmra.mrb[20].mxu1 %v3665_v8  ;;  %v2145_v27 = vor.u32 %v2144_v44, %v2141_v51  ;;  %v2150_v30 = vrot.slane %v2148_v25, 5  ;;  %v1794_v32 = vshrl.u32 %v3656_v26, 16  ;;  %v1797_v34 = vshll.u32 %v3656_v26, 16 }
 0x1f2   : > { %3076 = vmatprep.mubr.bf16.mxu1 %v3694_v9  ;;  %v1803_v12 = vshll.u32 %v3657_v1, 16  ;;  %v1808_v21 = vshrl.u32 %v3658_v45, 16  ;;  %v1811_v3 = vshll.u32 %v3658_v45, 16  ;;  %v3680_v10 = vcombine.low %v1875_v42, %v1875_v42 }
 0x1f3   : > { %v2146_v0 = vrot.slane %v2145_v27, 4  ;;  %v1796_v22 = vrot.slane %v1794_v32, 4  ;;  %v1799_v39 = vrot.slane %v1797_v34, 5  ;;  %v3681_v11 = vcombine.high %v1875_v42, %v1875_v42  ;;  %4069 = vmatpush3.bf16.msra.mxu1 %v4292_v24 }
 0x1f4   : > { %v1805_v54 = vrot.slane %v1803_v12, 5  ;;  %v1810_v55 = vrot.slane %v1808_v21, 4  ;;  %v1813_v23 = vrot.slane %v1811_v3, 5  ;;  %v1817_v13 = vshll.u32 %v3659_v18, 16  ;;  %4070 = vmatprep.subr.bf16.mxu1 %v4302_v40  ;;  %v2188_v3 = vld [vmem:[#allocation3 + $0x20] sm:$0x1e] }
 0x1f5   : > { %v2151_v2 = vsel %vm4421_vm2, %v2146_v0, %v2150_v30  ;;  %v1800_v48 = vor.u32 %v1799_v39, %v1796_v22  ;;  %v3682_v16 = vcombine.low %v1876_v20, %v1876_v20  ;;  %v3683_v4 = vcombine.high %v1876_v20, %v1876_v20  ;;  %v3261_v20 = vpop.permute.xlu0 %3260 }
 0x1f6   : > { %v3719_v37 = vcombine.low %v2151_v2, %v2165_v61  ;;  %v1814_v49 = vor.u32 %v1813_v23, %v1810_v55  ;;  %v3690_v50 = vrot.slane %v3680_v10, 9  ;;  %v1943_v57 = vrot.slane %v3681_v11, 5  ;;  %v2190_v11 = vld [vmem:[#allocation3 + $0x30] sm:$0x1e]  ;;  %v4325_v23 = vld [vmem:[%s5248_s3] sm:$0x3] }
 0x1f7   : > { %v1801_v5 = vrot.slane %v1800_v48, 4  ;;  %v3691_v14 = vrot.slane %v3682_v16, 9  ;;  %v1947_v41 = vrot.slane %v3683_v4, 5  ;;  %v3660_v28 = vcombine.low %v1695_v15, %v1695_v15  ;;  %4071 = vmatpush3.bf16.msra.mxu1 %v4302_v40  ;;  %v2189_v40 = vld [vmem:[#allocation3 + $0x28] sm:$0x1e] }
 0x1f8   : > { %3149 = vmatprep.mubr.bf16.mxu0 %v3719_v37  ;;  %v1815_v33 = vrot.slane %v1814_v49, 4  ;;  %v1819_v47 = vrot.slane %v1817_v13, 5  ;;  %v3661_v53 = vcombine.high %v1695_v15, %v1695_v15  ;;  %v3662_v58 = vcombine.low %v1696_v36, %v1696_v36  ;;  %4072 = vmatprep.subr.bf16.mxu1 %v4303_v56  ;;  %v2191_v2 = vld [vmem:[#allocation3 + $0x38] sm:$0x1e] }
 0x1f9   : > { %v1944_v59 = vsel %vm4801_vm12, %v3690_v50, %v1943_v57  ;;  %v1948_v63 = vsel %vm4801_vm12, %v3691_v14, %v1947_v41  ;;  %3150 = vmatmul.mubr.bf16.gmra.mrb[36].mxu0 %v4301_v17  ;;  %v3663_v7 = vcombine.high %v1696_v36, %v1696_v36  ;;  %v1822_v6 = vshrl.u32 %v3660_v28, 16 }
 0x1fa   : > { %v1806_v61 = vsel %vm4421_vm2, %v1801_v5, %v1805_v54  ;;  %v1820_v24 = vsel %vm4421_vm2, %v1815_v33, %v1819_v47  ;;  %v3695_v52 = vcombine.low %v1944_v59, %v1948_v63  ;;  %4086 = vmatprep.mubr.msk.bf16.mxu0 %vm312_vm3, %v3259_v35  ;;  %v1825_v46 = vshll.u32 %v3660_v28, 16  ;;  %v2193_v33 = vld [vmem:[#allocation3 + $0x48] sm:$0x1e] }
 0x1fb   : > { %v3666_v25 = vcombine.low %v1806_v61, %v1820_v24  ;;  %v1824_v26 = vrot.slane %v1822_v6, 4  ;;  %v1836_v8 = vshrl.u32 %v3662_v58, 16  ;;  %v1839_v38 = vshll.u32 %v3662_v58, 16  ;;  %4073 = vmatpush3.bf16.msra.mxu1 %v4303_v56  ;;  %v2192_v58 = vld [vmem:[#allocation3 + $0x40] sm:$0x1e] }
 0x1fc   : > { %v1827_v51 = vrot.slane %v1825_v46, 5  ;;  %v1831_v44 = vshll.u32 %v3661_v53, 16  ;;  %v1845_v42 = vshll.u32 %v3663_v7, 16  ;;  %v3720_v9 = vcombine.low %v2186_v60, %v2186_v60  ;;  %4074 = vmatprep.subr.bf16.mxu1 %v4312_v19 }
 0x1fd   : > { %3077 = vmatmul.mubr.bf16.gmra.mrb[24].mxu1 %v3666_v25  ;;  %v1838_v1 = vrot.slane %v1836_v8, 4  ;;  %v1841_v45 = vrot.slane %v1839_v38, 5  ;;  %v3721_v18 = vcombine.high %v2186_v60, %v2186_v60  ;;  %v3722_v27 = vcombine.low %v2187_v31, %v2187_v31 }
 0x1fe   : > { %3084 = vmatprep.mubr.bf16.mxu1 %v3695_v52  ;;  %v1828_v30 = vor.u32 %v1827_v51, %v1824_v26  ;;  %v3723_v32 = vcombine.high %v2187_v31, %v2187_v31  ;;  %v3736_v34 = vrot.slane %v3720_v9, 9  ;;  %v1833_v0 = vrot.slane %v1831_v44, 5 }
 0x1ff   : > { %v1842_v12 = vor.u32 %v1841_v45, %v1838_v1  ;;  %v2236_v21 = vrot.slane %v3721_v18, 5  ;;  %v3737_v22 = vrot.slane %v3722_v27, 9  ;;  %4075 = vmatpush3.bf16.msra.mxu1 %v4312_v19  ;;  %v1847_v55 = vrot.slane %v1845_v42, 5  ;;  %v3263_v1 = vpop.permute.xlu1 %3262 }
 0x200   : > { %v1829_v10 = vrot.slane %v1828_v30, 4  ;;  %v2240_v39 = vrot.slane %v3723_v32, 5  ;;  %4098 = vmatprep.subr.msk.bf16.mxu1 %vm1058_vm4, %v4325_v23  ;;  %v3726_v13 = vcombine.low %v2189_v40, %v2189_v40  ;;  %v3727_v15 = vcombine.high %v2189_v40, %v2189_v40 }
 0x201   : > { %v1843_v54 = vrot.slane %v1842_v12, 4  ;;  %4087 = vmatmul.mubr.msk.bf16.vlgmr.msra.gmra.mrb[40].mxu0 %vm312_vm3, %v3261_v20  ;;  %v2237_v48 = vsel %vm4801_vm12, %v3736_v34, %v2236_v21  ;;  %v3724_v16 = vcombine.low %v2188_v3, %v2188_v3  ;;  %v3725_v36 = vcombine.high %v2188_v3, %v2188_v3 }
 0x202   : > { %v1834_v4 = vsel %vm4421_vm2, %v1829_v10, %v1833_v0  ;;  %v3728_v37 = vcombine.low %v2190_v11, %v2190_v11  ;;  %v2241_v50 = vsel %vm4801_vm12, %v3737_v22, %v2240_v39  ;;  %v3729_v57 = vcombine.high %v2190_v11, %v2190_v11 }
 0x203   : > { %v1848_v56 = vsel %vm4421_vm2, %v1843_v54, %v1847_v55  ;;  %v3730_v5 = vcombine.low %v2191_v2, %v2191_v2  ;;  %v3744_v14 = vcombine.low %v2237_v48, %v2241_v50  ;;  %v3739_v41 = vrot.slane %v3726_v13, 9  ;;  %v3265_v45 = vpop.permute.xlu1 %3264 }
 0x204   : > { %v3667_v49 = vcombine.low %v1834_v4, %v1848_v56  ;;  %v2248_v17 = vrot.slane %v3727_v15, 5  ;;  %v3731_v28 = vcombine.high %v2191_v2, %v2191_v2  ;;  %v3740_v47 = vrot.slane %v3728_v37, 9 }
 0x205   : > { %v2252_v53 = vrot.slane %v3729_v57, 5  ;;  %v3738_v29 = vrot.slane %v3724_v16, 9  ;;  %v2244_v35 = vrot.slane %v3725_v36, 5  ;;  %v3741_v59 = vrot.slane %v3730_v5, 9 }
 0x206   : > { %3085 = vmatmul.mubr.bf16.gmra.mrb[28].mxu1 %v3667_v49  ;;  %v2256_v63 = vrot.slane %v3731_v28, 5  ;;  %v3734_v7 = vcombine.low %v2193_v33, %v2193_v33  ;;  %v2249_v6 = vsel %vm4801_vm12, %v3739_v41, %v2248_v17  ;;  %v3732_v60 = vcombine.low %v2192_v58, %v2192_v58 }
 0x207   : > { %4076 = vmatprep.mubr.bf16.mxu1 %v3744_v14  ;;  %v3733_v19 = vcombine.high %v2192_v58, %v2192_v58  ;;  %v3735_v61 = vcombine.high %v2193_v33, %v2193_v33  ;;  %v2253_v24 = vsel %vm4801_vm12, %v3740_v47, %v2252_v53  ;;  %v2245_v52 = vsel %vm4801_vm12, %v3738_v29, %v2244_v35 }
 0x208   : > { %v3745_v46 = vcombine.low %v2245_v52, %v2249_v6  ;;  %v2257_v31 = vsel %vm4801_vm12, %v3741_v59, %v2256_v63  ;;  %v3743_v25 = vrot.slane %v3734_v7, 9  ;;  %v3742_v8 = vrot.slane %v3732_v60, 9 }
 0x209   : > { %v3746_v26 = vcombine.low %v2253_v24, %v2257_v31  ;;  %v2260_v38 = vrot.slane %v3733_v19, 5  ;;  %v2264_v51 = vrot.slane %v3735_v61, 5 }
 0x20b   : > { %v2261_v44 = vsel %vm4801_vm12, %v3742_v8, %v2260_v38  ;;  %v2265_v42 = vsel %vm4801_vm12, %v3743_v25, %v2264_v51 }
 0x20c   : > { %v3747_v9 = vcombine.low %v2261_v44, %v2265_v42 }
 0x20e   : > { %4077 = vmatmul.mubr.bf16.vlgmr.msra.gmra.mrb[32].mxu1 %v3745_v46 }
 0x20f   : > { %4095 = vmatpush3.bf16.msra.mxu1 %v4827_v62  ;;  %4080 = vmatprep.mubr.bf16.mxu1 %v3746_v26 }
 0x216   : > { %4081 = vmatmul.mubr.bf16.gmra.mrb[36].mxu1 %v3747_v9 }
 0x217   : > { %4090 = vmatprep.mubr.msk.bf16.mxu1 %vm312_vm3, %v3263_v1 }
 0x21e   : > { %4091 = vmatmul.mubr.msk.bf16.vlgmr.msra.gmra.mrb[40].mxu1 %vm312_vm3, %v3265_v45 }
 0x27c   : > { %v3925_v18 = vpop.f32.mrb[8].mxu0 }
 0x27d   : > { %v3926_v27 = vpop.f32.mrb[9].mxu0 }
 0x27e   : > { %v3927_v30 = vadd.f32 %v3926_v27, %v3925_v18  ;;  %v3928_v32 = vpop.f32.mrb[10].mxu0 }
 0x27f   : > { %v3929_v62 = vpop.f32.mrb[11].mxu0 }
 0x280   : > { %v3930_v34 = vadd.f32 %v3929_v62, %v3928_v32 }
 0x284   : > { %v3885_v40 = vpop.f32.mrb[0].mxu1 }
 0x285   : > { %v3886_v12 = vpop.f32.mrb[1].mxu1 }
 0x286   : > { %v3887_v21 = vadd.f32 %v3886_v12, %v3885_v40  ;;  %v3888_v3 = vpop.f32.mrb[2].mxu1 }
 0x287   : > { %v3889_v43 = vpop.f32.mrb[3].mxu1 }
 0x288   : > { %v2998_v20 = vadd.f32 %v3927_v30, %v3887_v21  ;;  %v3890_v10 = vadd.f32 %v3889_v43, %v3888_v3  ;;  %v3931_v0 = vpop.f32.mrb[12].mxu0 }
 0x289   : > { %v3932_v22 = vpop.f32.mrb[13].mxu0 }
 0x28a   : > { %v3001_v39 = vadd.f32 %v3930_v34, %v3890_v10  ;;  %v3933_v11 = vadd.f32 %v3932_v22, %v3931_v0  ;;  %v3934_v54 = vpop.f32.mrb[14].mxu0 }
 0x28b   : > { %v3935_v55 = vpop.f32.mrb[15].mxu0 }
 0x28c   : > { %v3891_v23 = vpop.f32.mrb[4].mxu1  ;;  %v3936_v13 = vadd.f32 %v3935_v55, %v3934_v54 }
 0x28d   : > { %v3892_v15 = vpop.f32.mrb[5].mxu1 }
 0x28e   : > { %v3893_v2 = vadd.f32 %v3892_v15, %v3891_v23  ;;  %v3894_v48 = vpop.f32.mrb[6].mxu1 }
 0x28f   : > { %v3895_v16 = vpop.f32.mrb[7].mxu1 }
 0x290   : > { %v5191_v4 = vadd.f32 %v3933_v11, %v3893_v2  ;;  %v3896_v56 = vadd.f32 %v3895_v16, %v3894_v48 }
 0x292   : > { %v5193_v36 = vadd.f32 %v3936_v13, %v3896_v56 }
 0x29d   : > { %v3937_v37 = vpop.f32.mrb[16].mxu0 }
 0x29e   : > { %v3938_v49 = vpop.f32.mrb[17].mxu0 }
 0x29f   : > { %v3939_v50 = vadd.f32 %v3938_v49, %v3937_v37  ;;  %v3940_v57 = vpop.f32.mrb[18].mxu0 }
 0x2a0   : > { %v3941_v5 = vpop.f32.mrb[19].mxu0 }
 0x2a1   : > { %v3942_v14 = vadd.f32 %v3941_v5, %v3940_v57 }
 0x2a4   : > { %v3897_v41 = vpop.f32.mrb[8].mxu1 }
 0x2a5   : > { %v3898_v17 = vpop.f32.mrb[9].mxu1  ;;  %v3943_v28 = vpop.f32.mrb[20].mxu0 }
 0x2a6   : > { %v3899_v33 = vadd.f32 %v3898_v17, %v3897_v41  ;;  %v3900_v47 = vpop.f32.mrb[10].mxu1  ;;  %v3944_v53 = vpop.f32.mrb[21].mxu0 }
 0x2a7   : > { %v3945_v58 = vadd.f32 %v3944_v53, %v3943_v28  ;;  %v3901_v29 = vpop.f32.mrb[11].mxu1  ;;  %v3946_v35 = vpop.f32.mrb[22].mxu0 }
 0x2a8   : > { %v3014_v59 = vadd.f32 %v3939_v50, %v3899_v33  ;;  %v3902_v63 = vadd.f32 %v3901_v29, %v3900_v47  ;;  %v3947_v7 = vpop.f32.mrb[23].mxu0 }
 0x2a9   : > { %v3948_v6 = vadd.f32 %v3947_v7, %v3946_v35 }
 0x2aa   : > { %v3017_v60 = vadd.f32 %v3942_v14, %v3902_v63 }
 0x2ac   : > { %v3903_v19 = vpop.f32.mrb[12].mxu1 }
 0x2ad   : > { %v3904_v61 = vpop.f32.mrb[13].mxu1  ;;  %v4005_v24 = vpop.f32.mrb[24].mxu0 }
 0x2ae   : > { %v3905_v52 = vadd.f32 %v3904_v61, %v3903_v19  ;;  %v3906_v46 = vpop.f32.mrb[14].mxu1  ;;  %v4006_v31 = vpop.f32.mrb[25].mxu0 }
 0x2af   : > { %v4007_v25 = vadd.f32 %v4006_v31, %v4005_v24  ;;  %v3907_v26 = vpop.f32.mrb[15].mxu1  ;;  %v4008_v8 = vpop.f32.mrb[26].mxu0 }
 0x2b0   : > { %v3022_v38 = vadd.f32 %v3945_v58, %v3905_v52  ;;  %v3908_v51 = vadd.f32 %v3907_v26, %v3906_v46  ;;  %v4009_v44 = vpop.f32.mrb[27].mxu0 }
 0x2b1   : > { %v4010_v42 = vadd.f32 %v4009_v44, %v4008_v8 }
 0x2b2   : > { %v3025_v9 = vadd.f32 %v3948_v6, %v3908_v51 }
 0x2b5   : > { %v4011_v1 = vpop.f32.mrb[28].mxu0  ;;  %v3965_v45 = vpop.f32.mrb[16].mxu1 }
 0x2b6   : > { %v4012_v18 = vpop.f32.mrb[29].mxu0  ;;  %v3966_v27 = vpop.f32.mrb[17].mxu1 }
 0x2b7   : > { %v4013_v30 = vadd.f32 %v4012_v18, %v4011_v1  ;;  %v4014_v32 = vpop.f32.mrb[30].mxu0  ;;  %v3967_v62 = vadd.f32 %v3966_v27, %v3965_v45  ;;  %v3968_v34 = vpop.f32.mrb[18].mxu1 }
 0x2b8   : > { %v4015_v40 = vpop.f32.mrb[31].mxu0  ;;  %v3969_v12 = vpop.f32.mrb[19].mxu1 }
 0x2b9   : > { %v4016_v21 = vadd.f32 %v4015_v40, %v4014_v32  ;;  %v3063_v3 = vadd.f32 %v3967_v62, %v2998_v20  ;;  %v3970_v43 = vadd.f32 %v3969_v12, %v3968_v34 }
 0x2bb   : > { %v3066_v10 = vadd.f32 %v3970_v43, %v3001_v39  ;;  %v3128_v0 = vadd.f32 %v4007_v25, %v3063_v3 }
 0x2bd   : > { %v5195_v22 = vadd.f32 %v4010_v42, %v3066_v10  ;;  %v5202_v42 = vld [vmem:[%s5251_s6] ss:$0 sm:$0xff] }
 0x2c0   : > { %v4017_v11 = vpop.f32.mrb[32].mxu0 }
 0x2c1   : > { %v4018_v54 = vpop.f32.mrb[33].mxu0 }
 0x2c2   : > { %v4019_v55 = vadd.f32 %v4018_v54, %v4017_v11  ;;  %v4020_v23 = vpop.f32.mrb[34].mxu0 }
 0x2c3   : > { %v4021_v13 = vpop.f32.mrb[35].mxu0 }
 0x2c4   : > { %v3971_v15 = vpop.f32.mrb[20].mxu1  ;;  %v4022_v2 = vadd.f32 %v4021_v13, %v4020_v23 }
 0x2c5   : > { %v3972_v48 = vpop.f32.mrb[21].mxu1 }
 0x2c6   : > { %v3973_v16 = vadd.f32 %v3972_v48, %v3971_v15  ;;  %v3974_v56 = vpop.f32.mrb[22].mxu1 }
 0x2c7   : > { %v3975_v37 = vpop.f32.mrb[23].mxu1 }
 0x2c8   : > { %v3071_v49 = vadd.f32 %v3973_v16, %v5191_v4  ;;  %v3976_v50 = vadd.f32 %v3975_v37, %v3974_v56 }
 0x2ca   : > { %v3074_v20 = vadd.f32 %v3976_v50, %v5193_v36  ;;  %v3136_v39 = vadd.f32 %v4013_v30, %v3071_v49 }
 0x2cc   : > { %v4023_v57 = vpop.f32.mrb[36].mxu0  ;;  %v3139_v5 = vadd.f32 %v4016_v21, %v3074_v20 }
 0x2cd   : > { %v4024_v14 = vpop.f32.mrb[37].mxu0 }
 0x2ce   : > { %v4025_v41 = vadd.f32 %v4024_v14, %v4023_v57  ;;  %v4026_v17 = vpop.f32.mrb[38].mxu0 }
 0x2cf   : > { %v4027_v28 = vpop.f32.mrb[39].mxu0 }
 0x2d0   : > { %v3977_v33 = vpop.f32.mrb[24].mxu1  ;;  %v4028_v47 = vadd.f32 %v4027_v28, %v4026_v17 }
 0x2d1   : > { %v3978_v53 = vpop.f32.mrb[25].mxu1 }
 0x2d2   : > { %v3979_v58 = vadd.f32 %v3978_v53, %v3977_v33  ;;  %v3980_v29 = vpop.f32.mrb[26].mxu1 }
 0x2d3   : > { %v3981_v35 = vpop.f32.mrb[27].mxu1 }
 0x2d4   : > { %v3079_v63 = vadd.f32 %v3979_v58, %v3014_v59  ;;  %v3982_v7 = vadd.f32 %v3981_v35, %v3980_v29  ;;  %v4088_v6 = vpop.f32.mrb[40].mxu0 }
 0x2d5   : > { %v3315_v4 = vpop.f32.mrb[41].mxu0  ;;  %v3353_v27 = vmul.f32 %v4088_v6, %v5202_v42 }
 0x2d6   : > { %v3082_v19 = vadd.f32 %v3982_v7, %v3017_v60  ;;  %v4089_v61 = vpop.f32.mrb[42].mxu0  ;;  %v3144_v36 = vadd.f32 %v4019_v55, %v3079_v63  ;;  %v3820_v60 = vld [vmem:[%s5250_s5] ss:$0 sm:$0xff]  ;;  %v3351_v62 = vmul.f32 %v5202_v42, %v3315_v4 }
 0x2d7   : > { %v3318_v24 = vpop.f32.mrb[43].mxu0  ;;  %v3354_v12 = vmul.f32 %v4089_v61, %v5202_v42 }
 0x2d8   : > { %v3147_v52 = vadd.f32 %v4022_v2, %v3082_v19  ;;  %v3352_v10 = vmul.f32 %v5202_v42, %v3318_v24 }
 0x2d9   : > { %v3983_v46 = vpop.f32.mrb[28].mxu1 }
 0x2da   : > { %v3984_v31 = vpop.f32.mrb[29].mxu1 }
 0x2db   : > { %v3985_v25 = vadd.f32 %v3984_v31, %v3983_v46  ;;  %v3986_v26 = vpop.f32.mrb[30].mxu1 }
 0x2dc   : > { %v3987_v8 = vpop.f32.mrb[31].mxu1 }
 0x2dd   : > { %v3087_v51 = vadd.f32 %v3985_v25, %v3022_v38  ;;  %v3988_v44 = vadd.f32 %v3987_v8, %v3986_v26  ;;  %v5211_v38 = vld [vmem:[%s5251_s6 + $0x1] ss:$0 sm:$0xff] }
 0x2de   : > { %v3366_v55 = vadd.f32 %v5211_v38, %v3353_v27  ;;  %v3364_v15 = vadd.f32 %v5211_v38, %v3351_v62  ;;  %v3367_v48 = vadd.f32 %v5211_v38, %v3354_v12  ;;  %v3365_v37 = vadd.f32 %v5211_v38, %v3352_v10 }
 0x2df   : > { %v3090_v59 = vadd.f32 %v3988_v44, %v3025_v9  ;;  %v3152_v1 = vadd.f32 %v4025_v41, %v3087_v51  ;;  %v3821_v9 = vld [vmem:[%s5250_s5 + $0x1] ss:$0 sm:$0xff] }
 0x2e1   : > { %v4078_v45 = vpop.f32.mrb[32].mxu1  ;;  %v3155_v18 = vadd.f32 %v4028_v47, %v3090_v59 }
 0x2e2   : > { %v3201_v30 = vadd.f32 %v4078_v45, %v3136_v39  ;;  %v3192_v32 = vpop.f32.mrb[33].mxu1 }
 0x2e3   : > { %v3193_v34 = vadd.f32 %v3192_v32, %v3128_v0  ;;  %v4079_v40 = vpop.f32.mrb[34].mxu1 }
 0x2e4   : > { %v3230_v21 = vmul.f32 %v3820_v60, %v3201_v30  ;;  %v3204_v3 = vadd.f32 %v4079_v40, %v3139_v5  ;;  %v3195_v43 = vpop.f32.mrb[35].mxu1 }
 0x2e5   : > { %v3228_v11 = vmul.f32 %v3820_v60, %v3193_v34  ;;  %v3196_v54 = vadd.f32 %v3195_v43, %v5195_v22 }
 0x2e6   : > { %v3243_v23 = vadd.f32 %v3821_v9, %v3230_v21  ;;  %v3231_v13 = vmul.f32 %v3820_v60, %v3204_v3 }
 0x2e7   : > { %v3241_v2 = vadd.f32 %v3821_v9, %v3228_v11  ;;  %v3229_v0 = vmul.f32 %v3820_v60, %v3196_v54 }
 0x2e8   : > { %v3374_v16 = vadd.f32 %v3366_v55, %v3243_v23  ;;  %v3244_v56 = vadd.f32 %v3821_v9, %v3231_v13 }
 0x2e9   : > { %v3372_v49 = vadd.f32 %v3364_v15, %v3241_v2  ;;  %v3242_v50 = vadd.f32 %v3821_v9, %v3229_v0  ;;  %v4082_v20 = vpop.f32.mrb[36].mxu1 }
 0x2ea   : > { %v3375_v39 = vadd.f32 %v3367_v48, %v3244_v56  ;;  %v3217_v22 = vadd.f32 %v4082_v20, %v3152_v1  ;;  %v3208_v57 = vpop.f32.mrb[37].mxu1  ;;  %v3382_v17 = vmax.f32 %v3374_v16, 0.0 }
 0x2eb   : > { %v3373_v5 = vadd.f32 %v3365_v37, %v3242_v50  ;;  %v3209_v14 = vadd.f32 %v3208_v57, %v3144_v36  ;;  %v4083_v41 = vpop.f32.mrb[38].mxu1  ;;  %v3380_v53 = vmax.f32 %v3372_v49, 0.0 }
 0x2ec   : > { %v3383_v28 = vmax.f32 %v3375_v39, 0.0  ;;  %v3220_v33 = vadd.f32 %v4083_v41, %v3155_v18  ;;  %v3211_v47 = vpop.f32.mrb[39].mxu1  ;;  %v3234_v7 = vmul.f32 %v3820_v60, %v3217_v22 }
 0x2ed   : > { %v3381_v58 = vmax.f32 %v3373_v5, 0.0  ;;  %v3212_v29 = vadd.f32 %v3211_v47, %v3147_v52  ;;  %v3232_v6 = vmul.f32 %v3820_v60, %v3209_v14 }
 0x2ee   : > { %v3847_v35 = vpack.c.bf16 %v3383_v28, %v3382_v17  ;;  %v3235_v19 = vmul.f32 %v3820_v60, %v3220_v33  ;;  %v3247_v25 = vadd.f32 %v3821_v9, %v3234_v7 }
 0x2ef   : > { %v3842_v63 = vpack.c.bf16 %v3381_v58, %v3380_v53  ;;  %v3233_v24 = vmul.f32 %v3820_v60, %v3212_v29  ;;  %v3245_v51 = vadd.f32 %v3821_v9, %v3232_v6 }
 0x2f0   : > { %3859 = vst [vmem:[%s5228_s17 + $0x8] sm:$0xff] %v3847_v35   ;;  %v3248_v1 = vadd.f32 %v3821_v9, %v3235_v19 }
 0x2f1   : > { %3843 = vst [vmem:[%s5228_s17] sm:$0xff] %v3842_v63   ;;  %v4092_v4 = vpop.f32.mrb[40].mxu1  ;;  %v3246_v18 = vadd.f32 %v3821_v9, %v3233_v24 }
 0x2f2   : > { %v3357_v61 = vmul.f32 %v4092_v4, %v5202_v42  ;;  %v3331_v36 = vpop.f32.mrb[41].mxu1 }
 0x2f3   : > { %v3355_v46 = vmul.f32 %v5202_v42, %v3331_v36  ;;  %v4093_v31 = vpop.f32.mrb[42].mxu1 }
 0x2f4   : > { %v3370_v26 = vadd.f32 %v5211_v38, %v3357_v61  ;;  %v3358_v52 = vmul.f32 %v4093_v31, %v5202_v42  ;;  %v3334_v8 = vpop.f32.mrb[43].mxu1 }
 0x2f5   : > { %v3368_v44 = vadd.f32 %v5211_v38, %v3355_v46  ;;  %v3356_v59 = vmul.f32 %v5202_v42, %v3334_v8 }
 0x2f6   : > { %v3378_v45 = vadd.f32 %v3370_v26, %v3247_v25  ;;  %v3371_v60 = vadd.f32 %v5211_v38, %v3358_v52 }
 0x2f7   : > { %v3376_v27 = vadd.f32 %v3368_v44, %v3245_v51  ;;  %v3369_v30 = vadd.f32 %v5211_v38, %v3356_v59 }
 0x2f8   : > { %v3379_v32 = vadd.f32 %v3371_v60, %v3248_v1  ;;  %v3386_v34 = vmax.f32 %v3378_v45, 0.0 }
 0x2f9   : > { %v3377_v62 = vadd.f32 %v3369_v30, %v3246_v18  ;;  %v3384_v12 = vmax.f32 %v3376_v27, 0.0 }
 0x2fa   : > { %v3387_v40 = vmax.f32 %v3379_v32, 0.0 }
 0x2fb   : > { %v3385_v21 = vmax.f32 %v3377_v62, 0.0 }
 0x2fc   : > { %v3857_v3 = vpack.c.bf16 %v3387_v40, %v3386_v34 }
 0x2fd   : > { %v3852_v43 = vpack.c.bf16 %v3385_v21, %v3384_v12 }
 0x2fe   : > { %3861 = vst [vmem:[%s5228_s17 + $0x18] sm:$0xff] %v3857_v3  }
 0x2ff   : > { %3860 = vst [vmem:[%s5228_s17 + $0x10] sm:$0xff] %v3852_v43  }
 0x300 PF: > { %s17_s24 = sadd.s32 1, %s4332_s24  }
 0x301   : > { %p14_p4 = scmp.ge.s32.totalorder %s17_s24, 4  }
 0x303   :  { %16 = sbr.rel (!%p14_p4) target bundleno = 1 (0x1), region = 86 }

</bundles_post_ra>
